<compile_context>
chip_gen: v6e
topology: v6e:2x2x1
jax: 0.10.0
libtpu: 0.0.40
codegen_flags: <defaults>
</compile_context>

<pallas_src>
import functools

import jax
import jax.numpy as jnp
from jax.experimental import pallas as pl
from jax.experimental.pallas import tpu as pltpu


# ----------------------------- kernel helpers -----------------------------

def _conv_bn_lrelu(a, pad_ref, patch_ref, w_ref, b_ref, g_ref, be_ref, mask_ref,
                   *, K, W, NHW, OFF, eps, slope):
    """K x K SAME conv (cross-correlation) + BatchNorm(batch stats) + LeakyReLU.

    a: (Cin, NHW) value.  mask_ref: (K*K, NHW) 0/1 f32 border-validity masks.
    Returns (Cout, NHW) value.
    """
    cin = a.shape[0]
    P = K // 2

    # Activation in the middle of a flat 1-D halo buffer; halo strips are zeroed so the
    # masked multiply never touches NaN/inf garbage (tiny strips, not a full-buffer init).
    pad_ref[:, pl.ds(0, OFF)] = jnp.zeros((cin, OFF), jnp.float32)
    pad_ref[:, pl.ds(OFF + NHW, OFF)] = jnp.zeros((cin, OFF), jnp.float32)
    pad_ref[:, pl.ds(OFF, NHW)] = a

    # im2col: each tap is a lane-offset window of the flat buffer, zeroed at image borders
    # (and across image boundaries) by the precomputed 0/1 mask.
    t = 0
    for dy in range(-P, P + 1):
        for dx in range(-P, P + 1):
            off = dy * W + dx
            win = pad_ref[:, pl.ds(OFF + off, NHW)]           # (Cin, NHW)
            m = mask_ref[t:t + 1, :]                          # (1, NHW) exact 0.0 / 1.0
            patch_ref[t * cin:(t + 1) * cin, :] = win * m
            t += 1

    # Single fused matmul over the K*K*Cin contraction.
    y = jnp.dot(w_ref[...], patch_ref[...], preferred_element_type=jnp.float32)
    y = y + b_ref[...]                                        # (Cout, 1) broadcast

    # BatchNorm2d(track_running_stats=False): per-channel stats over (N, H, W) = lane axis.
    mean = jnp.mean(y, axis=1, keepdims=True)
    var = jnp.mean(jnp.square(y - mean), axis=1, keepdims=True)   # biased variance
    scale = g_ref[...] * jax.lax.rsqrt(var + eps)             # fold normalize + affine
    shift = be_ref[...] - mean * scale
    y = y * scale + shift

    # LeakyReLU(0.2)
    return jnp.where(y > 0, y, slope * y)


def _maxpool(h, pad_ref, mask_ref, sel_ref, *, W, NHW, OFF):
    """MaxPool2d(kernel=3, stride=(sh,sw), padding=1), PyTorch (-inf padding) semantics.

    h: (C, NHW).  sel_ref: (NHW, NOUT) precomputed one-hot selection matrix.
    Returns (C, NOUT).
    """
    C = h.shape[0]
    pad_ref[:, pl.ds(OFF, NHW)] = h
    m = jnp.full((C, NHW), -jnp.inf, jnp.float32)
    t = 0
    for dy in (-1, 0, 1):
        for dx in (-1, 0, 1):
            off = dy * W + dx
            win = pad_ref[:, pl.ds(OFF + off, NHW)]
            valid = mask_ref[t:t + 1, :] > 0.5                # (1, NHW) bool
            m = jnp.maximum(m, jnp.where(valid, win, -jnp.inf))
            t += 1
    # m[:, i] = max over the 3x3 window centered at flat position i (always finite since
    # the center tap is always valid).  Subsample at the output stride with a one-hot
    # selection matmul on the MXU (exact: entries are 1.0/0.0).
    return jnp.dot(m, sel_ref[...], preferred_element_type=jnp.float32)


def _encblock_kernel(x_ref, w1_ref, b1_ref, g1_ref, be1_ref,
                     w2_ref, b2_ref, g2_ref, be2_ref,
                     cmask_ref, pmask_ref, sel_ref, out_ref,
                     pad1_ref, patch1_ref, pad2_ref, patch2_ref,
                     *, H, W, K, NHW, OFF, eps, slope):
    del H  # geometry is fully encoded in the precomputed masks
    h1 = _conv_bn_lrelu(x_ref[...], pad1_ref, patch1_ref, w1_ref, b1_ref, g1_ref,
                        be1_ref, cmask_ref, K=K, W=W, NHW=NHW, OFF=OFF,
                        eps=eps, slope=slope)
    h2 = _conv_bn_lrelu(h1, pad2_ref, patch2_ref, w2_ref, b2_ref, g2_ref,
                        be2_ref, cmask_ref, K=K, W=W, NHW=NHW, OFF=OFF,
                        eps=eps, slope=slope)
    # pad2_ref is reused as the pool's halo buffer (conv2 is done with it by now; its
    # halo strips are still zero from the conv2 stage).
    out_ref[...] = _maxpool(h2, pad2_ref, pmask_ref, sel_ref, W=W, NHW=NHW, OFF=OFF)


# ------------------------------- wrapper ---------------------------------

def _tap_masks(N, H, W, K, NHW):
    """(K*K, NHW) f32 masks: tap (dy,dx) of flat position i lands inside its image."""
    P = K // 2
    flat = jnp.arange(NHW, dtype=jnp.int32)
    ys = (flat % (H * W)) // W
    xs = flat % W
    rows = []
    for dy in range(-P, P + 1):
        for dx in range(-P, P + 1):
            valid = (ys + dy >= 0) & (ys + dy < H) & (xs + dx >= 0) & (xs + dx < W)
            rows.append(valid)
    return jnp.stack(rows, axis=0).astype(jnp.float32)


def enc_block(x_nchw, params, downsample=True, kernel=3):
    """Pallas implementation of EncBlock.forward. Input/output are NCHW like PyTorch."""
    w1, b1, g1, be1, w2, b2, g2, be2 = params
    N, nin, H, W = x_nchw.shape
    nout = w1.shape[-1]
    K = kernel
    assert K % 2 == 1, "odd conv kernels only"
    P = K // 2
    sh, sw = (2, 2) if downsample else (2, 1)
    Ho = (H + 2 - 3) // sh + 1
    Wo = (W + 2 - 3) // sw + 1
    NHW = N * H * W
    NOUT = N * Ho * Wo
    OFF = max(P * W + P, W + 1)          # flat halo covers both conv and pool offsets

    # channel-major, lane-dense activation layout (C, N*H*W)
    x2 = jnp.transpose(x_nchw, (1, 0, 2, 3)).reshape(nin, NHW).astype(jnp.float32)

    # weights (HWIO) -> (Cout, K*K*Cin), matching the in-kernel (dy, dx, cin) patch order
    w1m = jnp.transpose(w1.reshape(K * K * nin, nout)).astype(jnp.float32)
    w2m = jnp.transpose(w2.reshape(K * K * nout, nout)).astype(jnp.float32)
    b1c = b1.reshape(nout, 1).astype(jnp.float32)
    g1c = g1.reshape(nout, 1).astype(jnp.float32)
    be1c = be1.reshape(nout, 1).astype(jnp.float32)
    b2c = b2.reshape(nout, 1).astype(jnp.float32)
    g2c = g2.reshape(nout, 1).astype(jnp.float32)
    be2c = be2.reshape(nout, 1).astype(jnp.float32)

    # shape-static tables (constant-fold under jit): conv tap masks, pool tap masks,
    # and the one-hot pool-subsample selection matrix.
    conv_masks = _tap_masks(N, H, W, K, NHW)                   # (K*K, NHW)
    pool_masks = conv_masks if K == 3 else _tap_masks(N, H, W, 3, NHW)   # (9, NHW)
    n_i, yo_i, xo_i = jnp.meshgrid(jnp.arange(N, dtype=jnp.int32),
                                   jnp.arange(Ho, dtype=jnp.int32),
                                   jnp.arange(Wo, dtype=jnp.int32), indexing="ij")
    src = (n_i * (H * W) + yo_i * sh * W + xo_i * sw).reshape(1, NOUT)
    selmat = (jnp.arange(NHW, dtype=jnp.int32).reshape(NHW, 1) == src
              ).astype(jnp.float32)                            # (NHW, NOUT) one-hot

    kern = functools.partial(_encblock_kernel, H=H, W=W, K=K, NHW=NHW,
                             OFF=OFF, eps=1e-5, slope=0.2)

    def full(shape):
        return pl.BlockSpec(shape, lambda i, s=shape: (0,) * len(s))

    out2 = pl.pallas_call(
        kern,
        out_shape=jax.ShapeDtypeStruct((nout, NOUT), jnp.float32),
        grid=(1,),
        in_specs=[full(x2.shape),
                  full(w1m.shape), full(b1c.shape), full(g1c.shape), full(be1c.shape),
                  full(w2m.shape), full(b2c.shape), full(g2c.shape), full(be2c.shape),
                  full(conv_masks.shape), full(pool_masks.shape), full(selmat.shape)],
        out_specs=full((nout, NOUT)),
        scratch_shapes=[
            pltpu.VMEM((nin, NHW + 2 * OFF), jnp.float32),    # conv1 flat halo buffer
            pltpu.VMEM((K * K * nin, NHW), jnp.float32),      # conv1 im2col patches
            pltpu.VMEM((nout, NHW + 2 * OFF), jnp.float32),   # conv2 / pool halo buffer
            pltpu.VMEM((K * K * nout, NHW), jnp.float32),     # conv2 im2col patches
        ],
        compiler_params=pltpu.CompilerParams(
            dimension_semantics=("arbitrary",)),
    )(x2, w1m, b1c, g1c, be1c, w2m, b2c, g2c, be2c, conv_masks, pool_masks, selmat)

    # layout plumbing only: (Cout, N*Ho*Wo) -> NCHW
    return out2.reshape(nout, N, Ho, Wo).transpose(1, 0, 2, 3)


# ----------------------------- pure-JAX reference -----------------------------

def enc_block_reference(x_nchw, params, downsample=True):
    w1, b1, g1, be1, w2, b2, g2, be2 = params
    x = jnp.transpose(x_nchw, (0, 2, 3, 1)).astype(jnp.float32)

    def stage(x, w, b, g, be):
        y = jax.lax.conv_general_dilated(
            x, w, window_strides=(1, 1), padding='SAME',
            dimension_numbers=('NHWC', 'HWIO', 'NHWC')) + b.reshape(1, 1, 1, -1)
        mean = jnp.mean(y, axis=(0, 1, 2), keepdims=True)
        var = jnp.mean((y - mean) ** 2, axis=(0, 1, 2), keepdims=True)
        y = (y - mean) * jax.lax.rsqrt(var + 1e-5)
        y = y * g.reshape(1, 1, 1, -1) + be.reshape(1, 1, 1, -1)
        return jnp.where(y > 0, y, 0.2 * y)

    y = stage(x, w1, b1, g1, be1)
    y = stage(y, w2, b2, g2, be2)
    sh, sw = (2, 2) if downsample else (2, 1)
    y = jax.lax.reduce_window(y, -jnp.inf, jax.lax.max,
                              window_dimensions=(1, 3, 3, 1),
                              window_strides=(1, sh, sw, 1),
                              padding=[(0, 0), (1, 1), (1, 1), (0, 0)])
    return jnp.transpose(y, (0, 3, 1, 2))


if __name__ == "__main__":
    N, nin, nout, H, W, K = 2, 4, 8, 16, 16, 3

    key = jax.random.PRNGKey(0)
    keys = jax.random.split(key, 9)
    x = jax.random.normal(keys[0], (N, nin, H, W), jnp.float32)

    w1 = 0.2 * jax.random.normal(keys[1], (K, K, nin, nout), jnp.float32)
    b1 = 0.1 * jax.random.normal(keys[2], (1, nout), jnp.float32)
    g1 = 1.0 + 0.1 * jax.random.normal(keys[3], (1, nout), jnp.float32)
    be1 = 0.1 * jax.random.normal(keys[4], (1, nout), jnp.float32)
    w2 = 0.2 * jax.random.normal(keys[5], (K, K, nout, nout), jnp.float32)
    b2 = 0.1 * jax.random.normal(keys[6], (1, nout), jnp.float32)
    g2 = 1.0 + 0.1 * jax.random.normal(keys[7], (1, nout), jnp.float32)
    be2 = 0.1 * jax.random.normal(keys[8], (1, nout), jnp.float32)
    params = (w1, b1, g1, be1, w2, b2, g2, be2)

    for downsample in (True, False):
        out = jax.block_until_ready(enc_block(x, params, downsample=downsample))
        ref = jax.block_until_ready(enc_block_reference(x, params, downsample=downsample))
        assert out.shape == ref.shape, (out.shape, ref.shape)
        if not bool(jnp.allclose(out, ref, rtol=1e-4, atol=1e-4)):
            raise AssertionError(
                f"mismatch (downsample={downsample}): max abs err "
                f"{float(jnp.max(jnp.abs(out - ref)))}")

    print("KERNEL_OK")
</pallas_src>

<mosaic_0001>
module attributes {stable_mosaic.version = 11 : i64} {
  func.func @_encblock_kernel(%arg0: i32, %arg1: memref<4x512xf32, #tpu.memory_space<vmem>>, %arg2: memref<8x36xf32, #tpu.memory_space<vmem>>, %arg3: memref<8x1xf32, #tpu.memory_space<vmem>>, %arg4: memref<8x1xf32, #tpu.memory_space<vmem>>, %arg5: memref<8x1xf32, #tpu.memory_space<vmem>>, %arg6: memref<8x72xf32, #tpu.memory_space<vmem>>, %arg7: memref<8x1xf32, #tpu.memory_space<vmem>>, %arg8: memref<8x1xf32, #tpu.memory_space<vmem>>, %arg9: memref<8x1xf32, #tpu.memory_space<vmem>>, %arg10: memref<9x512xf32, #tpu.memory_space<vmem>>, %arg11: memref<9x512xf32, #tpu.memory_space<vmem>>, %arg12: memref<512x128xf32, #tpu.memory_space<vmem>>, %arg13: memref<8x128xf32, #tpu.memory_space<vmem>>, %arg14: memref<4x546xf32, #tpu.memory_space<vmem>>, %arg15: memref<36x512xf32, #tpu.memory_space<vmem>>, %arg16: memref<8x546xf32, #tpu.memory_space<vmem>>, %arg17: memref<72x512xf32, #tpu.memory_space<vmem>>) attributes {dimension_semantics = [#tpu.dimension_semantics<arbitrary>], iteration_bounds = array<i64: 1>, scalar_prefetch = 0 : i64, scratch_operands = 4 : i64, tpu.core_type = #tpu.core_type<tc>, window_params = [{pipeline_mode = #tpu.pipeline_mode<synchronous>, transform_indices = @transform_0, window_bounds = array<i64: 4, 512>}, {pipeline_mode = #tpu.pipeline_mode<synchronous>, transform_indices = @transform_1, window_bounds = array<i64: 8, 36>}, {pipeline_mode = #tpu.pipeline_mode<synchronous>, transform_indices = @transform_2, window_bounds = array<i64: 8, 1>}, {pipeline_mode = #tpu.pipeline_mode<synchronous>, transform_indices = @transform_3, window_bounds = array<i64: 8, 1>}, {pipeline_mode = #tpu.pipeline_mode<synchronous>, transform_indices = @transform_4, window_bounds = array<i64: 8, 1>}, {pipeline_mode = #tpu.pipeline_mode<synchronous>, transform_indices = @transform_5, window_bounds = array<i64: 8, 72>}, {pipeline_mode = #tpu.pipeline_mode<synchronous>, transform_indices = @transform_6, window_bounds = array<i64: 8, 1>}, {pipeline_mode = #tpu.pipeline_mode<synchronous>, transform_indices = @transform_7, window_bounds = array<i64: 8, 1>}, {pipeline_mode = #tpu.pipeline_mode<synchronous>, transform_indices = @transform_8, window_bounds = array<i64: 8, 1>}, {pipeline_mode = #tpu.pipeline_mode<synchronous>, transform_indices = @transform_9, window_bounds = array<i64: 9, 512>}, {pipeline_mode = #tpu.pipeline_mode<synchronous>, transform_indices = @transform_10, window_bounds = array<i64: 9, 512>}, {pipeline_mode = #tpu.pipeline_mode<synchronous>, transform_indices = @transform_11, window_bounds = array<i64: 512, 128>}, {pipeline_mode = #tpu.pipeline_mode<synchronous>, transform_indices = @transform_12, window_bounds = array<i64: 8, 128>}]} {
    %c0 = arith.constant 0 : index
    %c0_0 = arith.constant 0 : index
    %0 = vector.load %arg1[%c0, %c0_0] : memref<4x512xf32, #tpu.memory_space<vmem>>, vector<4x512xf32>
    %cst = arith.constant 0.000000e+00 : f32
    %1 = vector.broadcast %cst : f32 to vector<4x17xf32>
    %c0_1 = arith.constant 0 : index
    %c0_2 = arith.constant 0 : index
    %2 = vector.load %arg14[%c0_1, %c0_2] : memref<4x546xf32, #tpu.memory_space<vmem>>, vector<4x17xf32>
    tpu.vector_store %arg14[%c0_1, %c0_2], %1 {strides = array<i32>} : memref<4x546xf32, #tpu.memory_space<vmem>>, vector<4x17xf32>,
    %cst_3 = arith.constant 0.000000e+00 : f32
    %3 = vector.broadcast %cst_3 : f32 to vector<4x17xf32>
    %c0_4 = arith.constant 0 : index
    %c529 = arith.constant 529 : index
    %4 = vector.load %arg14[%c0_4, %c529] : memref<4x546xf32, #tpu.memory_space<vmem>>, vector<4x17xf32>
    tpu.vector_store %arg14[%c0_4, %c529], %3 {strides = array<i32>} : memref<4x546xf32, #tpu.memory_space<vmem>>, vector<4x17xf32>,
    %c0_5 = arith.constant 0 : index
    %c17 = arith.constant 17 : index
    %5 = vector.load %arg14[%c0_5, %c17] : memref<4x546xf32, #tpu.memory_space<vmem>>, vector<4x512xf32>
    tpu.vector_store %arg14[%c0_5, %c17], %0 {strides = array<i32>} : memref<4x546xf32, #tpu.memory_space<vmem>>, vector<4x512xf32>,
    %c0_6 = arith.constant 0 : index
    %c0_7 = arith.constant 0 : index
    %6 = vector.load %arg14[%c0_6, %c0_7] : memref<4x546xf32, #tpu.memory_space<vmem>>, vector<4x512xf32>
    %c0_8 = arith.constant 0 : index
    %c0_9 = arith.constant 0 : index
    %7 = vector.load %arg10[%c0_8, %c0_9] : memref<9x512xf32, #tpu.memory_space<vmem>>, vector<1x512xf32>
    %8 = vector.broadcast %7 : vector<1x512xf32> to vector<4x512xf32>
    %9 = arith.mulf %6, %8 : vector<4x512xf32>
    %c0_10 = arith.constant 0 : index
    %c0_11 = arith.constant 0 : index
    %10 = vector.load %arg15[%c0_10, %c0_11] : memref<36x512xf32, #tpu.memory_space<vmem>>, vector<4x512xf32>
    tpu.vector_store %arg15[%c0_10, %c0_11], %9 {strides = array<i32>} : memref<36x512xf32, #tpu.memory_space<vmem>>, vector<4x512xf32>,
    %c0_12 = arith.constant 0 : index
    %c1 = arith.constant 1 : index
    %11 = vector.load %arg14[%c0_12, %c1] : memref<4x546xf32, #tpu.memory_space<vmem>>, vector<4x512xf32>
    %c1_13 = arith.constant 1 : index
    %c0_14 = arith.constant 0 : index
    %12 = vector.load %arg10[%c1_13, %c0_14] : memref<9x512xf32, #tpu.memory_space<vmem>>, vector<1x512xf32>
    %13 = vector.broadcast %12 : vector<1x512xf32> to vector<4x512xf32>
    %14 = arith.mulf %11, %13 : vector<4x512xf32>
    %c4 = arith.constant 4 : index
    %c0_15 = arith.constant 0 : index
    %15 = vector.load %arg15[%c4, %c0_15] : memref<36x512xf32, #tpu.memory_space<vmem>>, vector<4x512xf32>
    tpu.vector_store %arg15[%c4, %c0_15], %14 {strides = array<i32>} : memref<36x512xf32, #tpu.memory_space<vmem>>, vector<4x512xf32>,
    %c0_16 = arith.constant 0 : index
    %c2 = arith.constant 2 : index
    %16 = vector.load %arg14[%c0_16, %c2] : memref<4x546xf32, #tpu.memory_space<vmem>>, vector<4x512xf32>
    %c2_17 = arith.constant 2 : index
    %c0_18 = arith.constant 0 : index
    %17 = vector.load %arg10[%c2_17, %c0_18] : memref<9x512xf32, #tpu.memory_space<vmem>>, vector<1x512xf32>
    %18 = vector.broadcast %17 : vector<1x512xf32> to vector<4x512xf32>
    %19 = arith.mulf %16, %18 : vector<4x512xf32>
    %c8 = arith.constant 8 : index
    %c0_19 = arith.constant 0 : index
    %20 = vector.load %arg15[%c8, %c0_19] : memref<36x512xf32, #tpu.memory_space<vmem>>, vector<4x512xf32>
    tpu.vector_store %arg15[%c8, %c0_19], %19 {strides = array<i32>} : memref<36x512xf32, #tpu.memory_space<vmem>>, vector<4x512xf32>,
    %c0_20 = arith.constant 0 : index
    %c16 = arith.constant 16 : index
    %21 = vector.load %arg14[%c0_20, %c16] : memref<4x546xf32, #tpu.memory_space<vmem>>, vector<4x512xf32>
    %c3 = arith.constant 3 : index
    %c0_21 = arith.constant 0 : index
    %22 = vector.load %arg10[%c3, %c0_21] : memref<9x512xf32, #tpu.memory_space<vmem>>, vector<1x512xf32>
    %23 = vector.broadcast %22 : vector<1x512xf32> to vector<4x512xf32>
    %24 = arith.mulf %21, %23 : vector<4x512xf32>
    %c12 = arith.constant 12 : index
    %c0_22 = arith.constant 0 : index
    %25 = vector.load %arg15[%c12, %c0_22] : memref<36x512xf32, #tpu.memory_space<vmem>>, vector<4x512xf32>
    tpu.vector_store %arg15[%c12, %c0_22], %24 {strides = array<i32>} : memref<36x512xf32, #tpu.memory_space<vmem>>, vector<4x512xf32>,
    %c0_23 = arith.constant 0 : index
    %c17_24 = arith.constant 17 : index
    %26 = vector.load %arg14[%c0_23, %c17_24] : memref<4x546xf32, #tpu.memory_space<vmem>>, vector<4x512xf32>
    %c4_25 = arith.constant 4 : index
    %c0_26 = arith.constant 0 : index
    %27 = vector.load %arg10[%c4_25, %c0_26] : memref<9x512xf32, #tpu.memory_space<vmem>>, vector<1x512xf32>
    %28 = vector.broadcast %27 : vector<1x512xf32> to vector<4x512xf32>
    %29 = arith.mulf %26, %28 : vector<4x512xf32>
    %c16_27 = arith.constant 16 : index
    %c0_28 = arith.constant 0 : index
    %30 = vector.load %arg15[%c16_27, %c0_28] : memref<36x512xf32, #tpu.memory_space<vmem>>, vector<4x512xf32>
    tpu.vector_store %arg15[%c16_27, %c0_28], %29 {strides = array<i32>} : memref<36x512xf32, #tpu.memory_space<vmem>>, vector<4x512xf32>,
    %c0_29 = arith.constant 0 : index
    %c18 = arith.constant 18 : index
    %31 = vector.load %arg14[%c0_29, %c18] : memref<4x546xf32, #tpu.memory_space<vmem>>, vector<4x512xf32>
    %c5 = arith.constant 5 : index
    %c0_30 = arith.constant 0 : index
    %32 = vector.load %arg10[%c5, %c0_30] : memref<9x512xf32, #tpu.memory_space<vmem>>, vector<1x512xf32>
    %33 = vector.broadcast %32 : vector<1x512xf32> to vector<4x512xf32>
    %34 = arith.mulf %31, %33 : vector<4x512xf32>
    %c20 = arith.constant 20 : index
    %c0_31 = arith.constant 0 : index
    %35 = vector.load %arg15[%c20, %c0_31] : memref<36x512xf32, #tpu.memory_space<vmem>>, vector<4x512xf32>
    tpu.vector_store %arg15[%c20, %c0_31], %34 {strides = array<i32>} : memref<36x512xf32, #tpu.memory_space<vmem>>, vector<4x512xf32>,
    %c0_32 = arith.constant 0 : index
    %c32 = arith.constant 32 : index
    %36 = vector.load %arg14[%c0_32, %c32] : memref<4x546xf32, #tpu.memory_space<vmem>>, vector<4x512xf32>
    %c6 = arith.constant 6 : index
    %c0_33 = arith.constant 0 : index
    %37 = vector.load %arg10[%c6, %c0_33] : memref<9x512xf32, #tpu.memory_space<vmem>>, vector<1x512xf32>
    %38 = vector.broadcast %37 : vector<1x512xf32> to vector<4x512xf32>
    %39 = arith.mulf %36, %38 : vector<4x512xf32>
    %c24 = arith.constant 24 : index
    %c0_34 = arith.constant 0 : index
    %40 = vector.load %arg15[%c24, %c0_34] : memref<36x512xf32, #tpu.memory_space<vmem>>, vector<4x512xf32>
    tpu.vector_store %arg15[%c24, %c0_34], %39 {strides = array<i32>} : memref<36x512xf32, #tpu.memory_space<vmem>>, vector<4x512xf32>,
    %c0_35 = arith.constant 0 : index
    %c33 = arith.constant 33 : index
    %41 = vector.load %arg14[%c0_35, %c33] : memref<4x546xf32, #tpu.memory_space<vmem>>, vector<4x512xf32>
    %c7 = arith.constant 7 : index
    %c0_36 = arith.constant 0 : index
    %42 = vector.load %arg10[%c7, %c0_36] : memref<9x512xf32, #tpu.memory_space<vmem>>, vector<1x512xf32>
    %43 = vector.broadcast %42 : vector<1x512xf32> to vector<4x512xf32>
    %44 = arith.mulf %41, %43 : vector<4x512xf32>
    %c28 = arith.constant 28 : index
    %c0_37 = arith.constant 0 : index
    %45 = vector.load %arg15[%c28, %c0_37] : memref<36x512xf32, #tpu.memory_space<vmem>>, vector<4x512xf32>
    tpu.vector_store %arg15[%c28, %c0_37], %44 {strides = array<i32>} : memref<36x512xf32, #tpu.memory_space<vmem>>, vector<4x512xf32>,
    %c0_38 = arith.constant 0 : index
    %c34 = arith.constant 34 : index
    %46 = vector.load %arg14[%c0_38, %c34] : memref<4x546xf32, #tpu.memory_space<vmem>>, vector<4x512xf32>
    %c8_39 = arith.constant 8 : index
    %c0_40 = arith.constant 0 : index
    %47 = vector.load %arg10[%c8_39, %c0_40] : memref<9x512xf32, #tpu.memory_space<vmem>>, vector<1x512xf32>
    %48 = vector.broadcast %47 : vector<1x512xf32> to vector<4x512xf32>
    %49 = arith.mulf %46, %48 : vector<4x512xf32>
    %c32_41 = arith.constant 32 : index
    %c0_42 = arith.constant 0 : index
    %50 = vector.load %arg15[%c32_41, %c0_42] : memref<36x512xf32, #tpu.memory_space<vmem>>, vector<4x512xf32>
    tpu.vector_store %arg15[%c32_41, %c0_42], %49 {strides = array<i32>} : memref<36x512xf32, #tpu.memory_space<vmem>>, vector<4x512xf32>,
    %c0_43 = arith.constant 0 : index
    %c0_44 = arith.constant 0 : index
    %51 = vector.load %arg2[%c0_43, %c0_44] : memref<8x36xf32, #tpu.memory_space<vmem>>, vector<8x36xf32>
    %c0_45 = arith.constant 0 : index
    %c0_46 = arith.constant 0 : index
    %52 = vector.load %arg15[%c0_45, %c0_46] : memref<36x512xf32, #tpu.memory_space<vmem>>, vector<36x512xf32>
    %cst_47 = arith.constant dense<0.000000e+00> : vector<8x512xf32>
    %53 = tpu.matmul %51, %52, %cst_47 {dimension_numbers = #tpu.dot_dimension_numbers<[1], [0], [0], [1], [0, 0, 1, 1], [], []>} : vector<8x36xf32>, vector<36x512xf32>, vector<8x512xf32> -> vector<8x512xf32>
    %c0_48 = arith.constant 0 : index
    %c0_49 = arith.constant 0 : index
    %54 = vector.load %arg3[%c0_48, %c0_49] : memref<8x1xf32, #tpu.memory_space<vmem>>, vector<8x1xf32>
    %55 = vector.broadcast %54 : vector<8x1xf32> to vector<8x512xf32>
    %56 = arith.addf %53, %55 : vector<8x512xf32>
    %cst_50 = arith.constant dense<0.000000e+00> : vector<8xf32>
    %57 = vector.multi_reduction <add>, %56, %cst_50 [1] : vector<8x512xf32> to vector<8xf32>
    %58 = vector.shape_cast %57 : vector<8xf32> to vector<8x1xf32>
    %cst_51 = arith.constant 5.120000e+02 : f32
    %59 = vector.broadcast %cst_51 : f32 to vector<8x1xf32>
    %60 = arith.divf %58, %59 : vector<8x1xf32>
    %61 = vector.broadcast %60 : vector<8x1xf32> to vector<8x512xf32>
    %62 = arith.subf %56, %61 : vector<8x512xf32>
    %63 = arith.mulf %62, %62 : vector<8x512xf32>
    %cst_52 = arith.constant dense<0.000000e+00> : vector<8xf32>
    %64 = vector.multi_reduction <add>, %63, %cst_52 [1] : vector<8x512xf32> to vector<8xf32>
    %65 = vector.shape_cast %64 : vector<8xf32> to vector<8x1xf32>
    %cst_53 = arith.constant 5.120000e+02 : f32
    %66 = vector.broadcast %cst_53 : f32 to vector<8x1xf32>
    %67 = arith.divf %65, %66 : vector<8x1xf32>
    %c0_54 = arith.constant 0 : index
    %c0_55 = arith.constant 0 : index
    %68 = vector.load %arg4[%c0_54, %c0_55] : memref<8x1xf32, #tpu.memory_space<vmem>>, vector<8x1xf32>
    %cst_56 = arith.constant 9.99999974E-6 : f32
    %69 = vector.broadcast %cst_56 : f32 to vector<8x1xf32>
    %70 = arith.addf %67, %69 : vector<8x1xf32>
    %71 = math.rsqrt %70 : vector<8x1xf32>
    %72 = arith.mulf %68, %71 : vector<8x1xf32>
    %c0_57 = arith.constant 0 : index
    %c0_58 = arith.constant 0 : index
    %73 = vector.load %arg5[%c0_57, %c0_58] : memref<8x1xf32, #tpu.memory_space<vmem>>, vector<8x1xf32>
    %74 = arith.mulf %60, %72 : vector<8x1xf32>
    %75 = arith.subf %73, %74 : vector<8x1xf32>
    %76 = vector.broadcast %72 : vector<8x1xf32> to vector<8x512xf32>
    %77 = arith.mulf %56, %76 : vector<8x512xf32>
    %78 = vector.broadcast %75 : vector<8x1xf32> to vector<8x512xf32>
    %79 = arith.addf %77, %78 : vector<8x512xf32>
    %cst_59 = arith.constant 0.000000e+00 : f32
    %80 = vector.broadcast %cst_59 : f32 to vector<8x512xf32>
    %81 = arith.cmpf ogt, %79, %80 : vector<8x512xf32>
    %cst_60 = arith.constant 2.000000e-01 : f32
    %82 = vector.broadcast %cst_60 : f32 to vector<8x512xf32>
    %83 = arith.mulf %82, %79 : vector<8x512xf32>
    %84 = arith.select %81, %79, %83 : vector<8x512xi1>, vector<8x512xf32>
    %cst_61 = arith.constant 0.000000e+00 : f32
    %85 = vector.broadcast %cst_61 : f32 to vector<8x17xf32>
    %c0_62 = arith.constant 0 : index
    %c0_63 = arith.constant 0 : index
    %86 = vector.load %arg16[%c0_62, %c0_63] : memref<8x546xf32, #tpu.memory_space<vmem>>, vector<8x17xf32>
    tpu.vector_store %arg16[%c0_62, %c0_63], %85 {strides = array<i32>} : memref<8x546xf32, #tpu.memory_space<vmem>>, vector<8x17xf32>,
    %cst_64 = arith.constant 0.000000e+00 : f32
    %87 = vector.broadcast %cst_64 : f32 to vector<8x17xf32>
    %c0_65 = arith.constant 0 : index
    %c529_66 = arith.constant 529 : index
    %88 = vector.load %arg16[%c0_65, %c529_66] : memref<8x546xf32, #tpu.memory_space<vmem>>, vector<8x17xf32>
    tpu.vector_store %arg16[%c0_65, %c529_66], %87 {strides = array<i32>} : memref<8x546xf32, #tpu.memory_space<vmem>>, vector<8x17xf32>,
    %c0_67 = arith.constant 0 : index
    %c17_68 = arith.constant 17 : index
    %89 = vector.load %arg16[%c0_67, %c17_68] : memref<8x546xf32, #tpu.memory_space<vmem>>, vector<8x512xf32>
    tpu.vector_store %arg16[%c0_67, %c17_68], %84 {strides = array<i32>} : memref<8x546xf32, #tpu.memory_space<vmem>>, vector<8x512xf32>,
    %c0_69 = arith.constant 0 : index
    %c0_70 = arith.constant 0 : index
    %90 = vector.load %arg16[%c0_69, %c0_70] : memref<8x546xf32, #tpu.memory_space<vmem>>, vector<8x512xf32>
    %c0_71 = arith.constant 0 : index
    %c0_72 = arith.constant 0 : index
    %91 = vector.load %arg10[%c0_71, %c0_72] : memref<9x512xf32, #tpu.memory_space<vmem>>, vector<1x512xf32>
    %92 = vector.broadcast %91 : vector<1x512xf32> to vector<8x512xf32>
    %93 = arith.mulf %90, %92 : vector<8x512xf32>
    %c0_73 = arith.constant 0 : index
    %c0_74 = arith.constant 0 : index
    %94 = vector.load %arg17[%c0_73, %c0_74] : memref<72x512xf32, #tpu.memory_space<vmem>>, vector<8x512xf32>
    tpu.vector_store %arg17[%c0_73, %c0_74], %93 {strides = array<i32>} : memref<72x512xf32, #tpu.memory_space<vmem>>, vector<8x512xf32>,
    %c0_75 = arith.constant 0 : index
    %c1_76 = arith.constant 1 : index
    %95 = vector.load %arg16[%c0_75, %c1_76] : memref<8x546xf32, #tpu.memory_space<vmem>>, vector<8x512xf32>
    %c1_77 = arith.constant 1 : index
    %c0_78 = arith.constant 0 : index
    %96 = vector.load %arg10[%c1_77, %c0_78] : memref<9x512xf32, #tpu.memory_space<vmem>>, vector<1x512xf32>
    %97 = vector.broadcast %96 : vector<1x512xf32> to vector<8x512xf32>
    %98 = arith.mulf %95, %97 : vector<8x512xf32>
    %c8_79 = arith.constant 8 : index
    %c0_80 = arith.constant 0 : index
    %99 = vector.load %arg17[%c8_79, %c0_80] : memref<72x512xf32, #tpu.memory_space<vmem>>, vector<8x512xf32>
    tpu.vector_store %arg17[%c8_79, %c0_80], %98 {strides = array<i32>} : memref<72x512xf32, #tpu.memory_space<vmem>>, vector<8x512xf32>,
    %c0_81 = arith.constant 0 : index
    %c2_82 = arith.constant 2 : index
    %100 = vector.load %arg16[%c0_81, %c2_82] : memref<8x546xf32, #tpu.memory_space<vmem>>, vector<8x512xf32>
    %c2_83 = arith.constant 2 : index
    %c0_84 = arith.constant 0 : index
    %101 = vector.load %arg10[%c2_83, %c0_84] : memref<9x512xf32, #tpu.memory_space<vmem>>, vector<1x512xf32>
    %102 = vector.broadcast %101 : vector<1x512xf32> to vector<8x512xf32>
    %103 = arith.mulf %100, %102 : vector<8x512xf32>
    %c16_85 = arith.constant 16 : index
    %c0_86 = arith.constant 0 : index
    %104 = vector.load %arg17[%c16_85, %c0_86] : memref<72x512xf32, #tpu.memory_space<vmem>>, vector<8x512xf32>
    tpu.vector_store %arg17[%c16_85, %c0_86], %103 {strides = array<i32>} : memref<72x512xf32, #tpu.memory_space<vmem>>, vector<8x512xf32>,
    %c0_87 = arith.constant 0 : index
    %c16_88 = arith.constant 16 : index
    %105 = vector.load %arg16[%c0_87, %c16_88] : memref<8x546xf32, #tpu.memory_space<vmem>>, vector<8x512xf32>
    %c3_89 = arith.constant 3 : index
    %c0_90 = arith.constant 0 : index
    %106 = vector.load %arg10[%c3_89, %c0_90] : memref<9x512xf32, #tpu.memory_space<vmem>>, vector<1x512xf32>
    %107 = vector.broadcast %106 : vector<1x512xf32> to vector<8x512xf32>
    %108 = arith.mulf %105, %107 : vector<8x512xf32>
    %c24_91 = arith.constant 24 : index
    %c0_92 = arith.constant 0 : index
    %109 = vector.load %arg17[%c24_91, %c0_92] : memref<72x512xf32, #tpu.memory_space<vmem>>, vector<8x512xf32>
    tpu.vector_store %arg17[%c24_91, %c0_92], %108 {strides = array<i32>} : memref<72x512xf32, #tpu.memory_space<vmem>>, vector<8x512xf32>,
    %c0_93 = arith.constant 0 : index
    %c17_94 = arith.constant 17 : index
    %110 = vector.load %arg16[%c0_93, %c17_94] : memref<8x546xf32, #tpu.memory_space<vmem>>, vector<8x512xf32>
    %c4_95 = arith.constant 4 : index
    %c0_96 = arith.constant 0 : index
    %111 = vector.load %arg10[%c4_95, %c0_96] : memref<9x512xf32, #tpu.memory_space<vmem>>, vector<1x512xf32>
    %112 = vector.broadcast %111 : vector<1x512xf32> to vector<8x512xf32>
    %113 = arith.mulf %110, %112 : vector<8x512xf32>
    %c32_97 = arith.constant 32 : index
    %c0_98 = arith.constant 0 : index
    %114 = vector.load %arg17[%c32_97, %c0_98] : memref<72x512xf32, #tpu.memory_space<vmem>>, vector<8x512xf32>
    tpu.vector_store %arg17[%c32_97, %c0_98], %113 {strides = array<i32>} : memref<72x512xf32, #tpu.memory_space<vmem>>, vector<8x512xf32>,
    %c0_99 = arith.constant 0 : index
    %c18_100 = arith.constant 18 : index
    %115 = vector.load %arg16[%c0_99, %c18_100] : memref<8x546xf32, #tpu.memory_space<vmem>>, vector<8x512xf32>
    %c5_101 = arith.constant 5 : index
    %c0_102 = arith.constant 0 : index
    %116 = vector.load %arg10[%c5_101, %c0_102] : memref<9x512xf32, #tpu.memory_space<vmem>>, vector<1x512xf32>
    %117 = vector.broadcast %116 : vector<1x512xf32> to vector<8x512xf32>
    %118 = arith.mulf %115, %117 : vector<8x512xf32>
    %c40 = arith.constant 40 : index
    %c0_103 = arith.constant 0 : index
    %119 = vector.load %arg17[%c40, %c0_103] : memref<72x512xf32, #tpu.memory_space<vmem>>, vector<8x512xf32>
    tpu.vector_store %arg17[%c40, %c0_103], %118 {strides = array<i32>} : memref<72x512xf32, #tpu.memory_space<vmem>>, vector<8x512xf32>,
    %c0_104 = arith.constant 0 : index
    %c32_105 = arith.constant 32 : index
    %120 = vector.load %arg16[%c0_104, %c32_105] : memref<8x546xf32, #tpu.memory_space<vmem>>, vector<8x512xf32>
    %c6_106 = arith.constant 6 : index
    %c0_107 = arith.constant 0 : index
    %121 = vector.load %arg10[%c6_106, %c0_107] : memref<9x512xf32, #tpu.memory_space<vmem>>, vector<1x512xf32>
    %122 = vector.broadcast %121 : vector<1x512xf32> to vector<8x512xf32>
    %123 = arith.mulf %120, %122 : vector<8x512xf32>
    %c48 = arith.constant 48 : index
    %c0_108 = arith.constant 0 : index
    %124 = vector.load %arg17[%c48, %c0_108] : memref<72x512xf32, #tpu.memory_space<vmem>>, vector<8x512xf32>
    tpu.vector_store %arg17[%c48, %c0_108], %123 {strides = array<i32>} : memref<72x512xf32, #tpu.memory_space<vmem>>, vector<8x512xf32>,
    %c0_109 = arith.constant 0 : index
    %c33_110 = arith.constant 33 : index
    %125 = vector.load %arg16[%c0_109, %c33_110] : memref<8x546xf32, #tpu.memory_space<vmem>>, vector<8x512xf32>
    %c7_111 = arith.constant 7 : index
    %c0_112 = arith.constant 0 : index
    %126 = vector.load %arg10[%c7_111, %c0_112] : memref<9x512xf32, #tpu.memory_space<vmem>>, vector<1x512xf32>
    %127 = vector.broadcast %126 : vector<1x512xf32> to vector<8x512xf32>
    %128 = arith.mulf %125, %127 : vector<8x512xf32>
    %c56 = arith.constant 56 : index
    %c0_113 = arith.constant 0 : index
    %129 = vector.load %arg17[%c56, %c0_113] : memref<72x512xf32, #tpu.memory_space<vmem>>, vector<8x512xf32>
    tpu.vector_store %arg17[%c56, %c0_113], %128 {strides = array<i32>} : memref<72x512xf32, #tpu.memory_space<vmem>>, vector<8x512xf32>,
    %c0_114 = arith.constant 0 : index
    %c34_115 = arith.constant 34 : index
    %130 = vector.load %arg16[%c0_114, %c34_115] : memref<8x546xf32, #tpu.memory_space<vmem>>, vector<8x512xf32>
    %c8_116 = arith.constant 8 : index
    %c0_117 = arith.constant 0 : index
    %131 = vector.load %arg10[%c8_116, %c0_117] : memref<9x512xf32, #tpu.memory_space<vmem>>, vector<1x512xf32>
    %132 = vector.broadcast %131 : vector<1x512xf32> to vector<8x512xf32>
    %133 = arith.mulf %130, %132 : vector<8x512xf32>
    %c64 = arith.constant 64 : index
    %c0_118 = arith.constant 0 : index
    %134 = vector.load %arg17[%c64, %c0_118] : memref<72x512xf32, #tpu.memory_space<vmem>>, vector<8x512xf32>
    tpu.vector_store %arg17[%c64, %c0_118], %133 {strides = array<i32>} : memref<72x512xf32, #tpu.memory_space<vmem>>, vector<8x512xf32>,
    %c0_119 = arith.constant 0 : index
    %c0_120 = arith.constant 0 : index
    %135 = vector.load %arg6[%c0_119, %c0_120] : memref<8x72xf32, #tpu.memory_space<vmem>>, vector<8x72xf32>
    %c0_121 = arith.constant 0 : index
    %c0_122 = arith.constant 0 : index
    %136 = vector.load %arg17[%c0_121, %c0_122] : memref<72x512xf32, #tpu.memory_space<vmem>>, vector<72x512xf32>
    %cst_123 = arith.constant dense<0.000000e+00> : vector<8x512xf32>
    %137 = tpu.matmul %135, %136, %cst_123 {dimension_numbers = #tpu.dot_dimension_numbers<[1], [0], [0], [1], [0, 0, 1, 1], [], []>} : vector<8x72xf32>, vector<72x512xf32>, vector<8x512xf32> -> vector<8x512xf32>
    %c0_124 = arith.constant 0 : index
    %c0_125 = arith.constant 0 : index
    %138 = vector.load %arg7[%c0_124, %c0_125] : memref<8x1xf32, #tpu.memory_space<vmem>>, vector<8x1xf32>
    %139 = vector.broadcast %138 : vector<8x1xf32> to vector<8x512xf32>
    %140 = arith.addf %137, %139 : vector<8x512xf32>
    %cst_126 = arith.constant dense<0.000000e+00> : vector<8xf32>
    %141 = vector.multi_reduction <add>, %140, %cst_126 [1] : vector<8x512xf32> to vector<8xf32>
    %142 = vector.shape_cast %141 : vector<8xf32> to vector<8x1xf32>
    %cst_127 = arith.constant 5.120000e+02 : f32
    %143 = vector.broadcast %cst_127 : f32 to vector<8x1xf32>
    %144 = arith.divf %142, %143 : vector<8x1xf32>
    %145 = vector.broadcast %144 : vector<8x1xf32> to vector<8x512xf32>
    %146 = arith.subf %140, %145 : vector<8x512xf32>
    %147 = arith.mulf %146, %146 : vector<8x512xf32>
    %cst_128 = arith.constant dense<0.000000e+00> : vector<8xf32>
    %148 = vector.multi_reduction <add>, %147, %cst_128 [1] : vector<8x512xf32> to vector<8xf32>
    %149 = vector.shape_cast %148 : vector<8xf32> to vector<8x1xf32>
    %cst_129 = arith.constant 5.120000e+02 : f32
    %150 = vector.broadcast %cst_129 : f32 to vector<8x1xf32>
    %151 = arith.divf %149, %150 : vector<8x1xf32>
    %c0_130 = arith.constant 0 : index
    %c0_131 = arith.constant 0 : index
    %152 = vector.load %arg8[%c0_130, %c0_131] : memref<8x1xf32, #tpu.memory_space<vmem>>, vector<8x1xf32>
    %cst_132 = arith.constant 9.99999974E-6 : f32
    %153 = vector.broadcast %cst_132 : f32 to vector<8x1xf32>
    %154 = arith.addf %151, %153 : vector<8x1xf32>
    %155 = math.rsqrt %154 : vector<8x1xf32>
    %156 = arith.mulf %152, %155 : vector<8x1xf32>
    %c0_133 = arith.constant 0 : index
    %c0_134 = arith.constant 0 : index
    %157 = vector.load %arg9[%c0_133, %c0_134] : memref<8x1xf32, #tpu.memory_space<vmem>>, vector<8x1xf32>
    %158 = arith.mulf %144, %156 : vector<8x1xf32>
    %159 = arith.subf %157, %158 : vector<8x1xf32>
    %160 = vector.broadcast %156 : vector<8x1xf32> to vector<8x512xf32>
    %161 = arith.mulf %140, %160 : vector<8x512xf32>
    %162 = vector.broadcast %159 : vector<8x1xf32> to vector<8x512xf32>
    %163 = arith.addf %161, %162 : vector<8x512xf32>
    %cst_135 = arith.constant 0.000000e+00 : f32
    %164 = vector.broadcast %cst_135 : f32 to vector<8x512xf32>
    %165 = arith.cmpf ogt, %163, %164 : vector<8x512xf32>
    %cst_136 = arith.constant 2.000000e-01 : f32
    %166 = vector.broadcast %cst_136 : f32 to vector<8x512xf32>
    %167 = arith.mulf %166, %163 : vector<8x512xf32>
    %168 = arith.select %165, %163, %167 : vector<8x512xi1>, vector<8x512xf32>
    %c0_137 = arith.constant 0 : index
    %c17_138 = arith.constant 17 : index
    %169 = vector.load %arg16[%c0_137, %c17_138] : memref<8x546xf32, #tpu.memory_space<vmem>>, vector<8x512xf32>
    tpu.vector_store %arg16[%c0_137, %c17_138], %168 {strides = array<i32>} : memref<8x546xf32, #tpu.memory_space<vmem>>, vector<8x512xf32>,
    %cst_139 = arith.constant 0xFF800000 : f32
    %170 = vector.broadcast %cst_139 : f32 to vector<8x512xf32>
    %c0_140 = arith.constant 0 : index
    %c0_141 = arith.constant 0 : index
    %171 = vector.load %arg16[%c0_140, %c0_141] : memref<8x546xf32, #tpu.memory_space<vmem>>, vector<8x512xf32>
    %c0_142 = arith.constant 0 : index
    %c0_143 = arith.constant 0 : index
    %172 = vector.load %arg11[%c0_142, %c0_143] : memref<9x512xf32, #tpu.memory_space<vmem>>, vector<1x512xf32>
    %cst_144 = arith.constant 5.000000e-01 : f32
    %173 = vector.broadcast %cst_144 : f32 to vector<1x512xf32>
    %174 = arith.cmpf ogt, %172, %173 : vector<1x512xf32>
    %cst_145 = arith.constant 0xFF800000 : f32
    %175 = vector.shape_cast %174 : vector<1x512xi1> to vector<1x512xi1>
    %176 = vector.broadcast %175 : vector<1x512xi1> to vector<8x512xi1>
    %177 = vector.broadcast %cst_145 : f32 to vector<8x512xf32>
    %178 = arith.select %176, %171, %177 : vector<8x512xi1>, vector<8x512xf32>
    %179 = arith.maximumf %170, %178 : vector<8x512xf32>
    %c0_146 = arith.constant 0 : index
    %c1_147 = arith.constant 1 : index
    %180 = vector.load %arg16[%c0_146, %c1_147] : memref<8x546xf32, #tpu.memory_space<vmem>>, vector<8x512xf32>
    %c1_148 = arith.constant 1 : index
    %c0_149 = arith.constant 0 : index
    %181 = vector.load %arg11[%c1_148, %c0_149] : memref<9x512xf32, #tpu.memory_space<vmem>>, vector<1x512xf32>
    %cst_150 = arith.constant 5.000000e-01 : f32
    %182 = vector.broadcast %cst_150 : f32 to vector<1x512xf32>
    %183 = arith.cmpf ogt, %181, %182 : vector<1x512xf32>
    %cst_151 = arith.constant 0xFF800000 : f32
    %184 = vector.shape_cast %183 : vector<1x512xi1> to vector<1x512xi1>
    %185 = vector.broadcast %184 : vector<1x512xi1> to vector<8x512xi1>
    %186 = vector.broadcast %cst_151 : f32 to vector<8x512xf32>
    %187 = arith.select %185, %180, %186 : vector<8x512xi1>, vector<8x512xf32>
    %188 = arith.maximumf %179, %187 : vector<8x512xf32>
    %c0_152 = arith.constant 0 : index
    %c2_153 = arith.constant 2 : index
    %189 = vector.load %arg16[%c0_152, %c2_153] : memref<8x546xf32, #tpu.memory_space<vmem>>, vector<8x512xf32>
    %c2_154 = arith.constant 2 : index
    %c0_155 = arith.constant 0 : index
    %190 = vector.load %arg11[%c2_154, %c0_155] : memref<9x512xf32, #tpu.memory_space<vmem>>, vector<1x512xf32>
    %cst_156 = arith.constant 5.000000e-01 : f32
    %191 = vector.broadcast %cst_156 : f32 to vector<1x512xf32>
    %192 = arith.cmpf ogt, %190, %191 : vector<1x512xf32>
    %cst_157 = arith.constant 0xFF800000 : f32
    %193 = vector.shape_cast %192 : vector<1x512xi1> to vector<1x512xi1>
    %194 = vector.broadcast %193 : vector<1x512xi1> to vector<8x512xi1>
    %195 = vector.broadcast %cst_157 : f32 to vector<8x512xf32>
    %196 = arith.select %194, %189, %195 : vector<8x512xi1>, vector<8x512xf32>
    %197 = arith.maximumf %188, %196 : vector<8x512xf32>
    %c0_158 = arith.constant 0 : index
    %c16_159 = arith.constant 16 : index
    %198 = vector.load %arg16[%c0_158, %c16_159] : memref<8x546xf32, #tpu.memory_space<vmem>>, vector<8x512xf32>
    %c3_160 = arith.constant 3 : index
    %c0_161 = arith.constant 0 : index
    %199 = vector.load %arg11[%c3_160, %c0_161] : memref<9x512xf32, #tpu.memory_space<vmem>>, vector<1x512xf32>
    %cst_162 = arith.constant 5.000000e-01 : f32
    %200 = vector.broadcast %cst_162 : f32 to vector<1x512xf32>
    %201 = arith.cmpf ogt, %199, %200 : vector<1x512xf32>
    %cst_163 = arith.constant 0xFF800000 : f32
    %202 = vector.shape_cast %201 : vector<1x512xi1> to vector<1x512xi1>
    %203 = vector.broadcast %202 : vector<1x512xi1> to vector<8x512xi1>
    %204 = vector.broadcast %cst_163 : f32 to vector<8x512xf32>
    %205 = arith.select %203, %198, %204 : vector<8x512xi1>, vector<8x512xf32>
    %206 = arith.maximumf %197, %205 : vector<8x512xf32>
    %c0_164 = arith.constant 0 : index
    %c17_165 = arith.constant 17 : index
    %207 = vector.load %arg16[%c0_164, %c17_165] : memref<8x546xf32, #tpu.memory_space<vmem>>, vector<8x512xf32>
    %c4_166 = arith.constant 4 : index
    %c0_167 = arith.constant 0 : index
    %208 = vector.load %arg11[%c4_166, %c0_167] : memref<9x512xf32, #tpu.memory_space<vmem>>, vector<1x512xf32>
    %cst_168 = arith.constant 5.000000e-01 : f32
    %209 = vector.broadcast %cst_168 : f32 to vector<1x512xf32>
    %210 = arith.cmpf ogt, %208, %209 : vector<1x512xf32>
    %cst_169 = arith.constant 0xFF800000 : f32
    %211 = vector.shape_cast %210 : vector<1x512xi1> to vector<1x512xi1>
    %212 = vector.broadcast %211 : vector<1x512xi1> to vector<8x512xi1>
    %213 = vector.broadcast %cst_169 : f32 to vector<8x512xf32>
    %214 = arith.select %212, %207, %213 : vector<8x512xi1>, vector<8x512xf32>
    %215 = arith.maximumf %206, %214 : vector<8x512xf32>
    %c0_170 = arith.constant 0 : index
    %c18_171 = arith.constant 18 : index
    %216 = vector.load %arg16[%c0_170, %c18_171] : memref<8x546xf32, #tpu.memory_space<vmem>>, vector<8x512xf32>
    %c5_172 = arith.constant 5 : index
    %c0_173 = arith.constant 0 : index
    %217 = vector.load %arg11[%c5_172, %c0_173] : memref<9x512xf32, #tpu.memory_space<vmem>>, vector<1x512xf32>
    %cst_174 = arith.constant 5.000000e-01 : f32
    %218 = vector.broadcast %cst_174 : f32 to vector<1x512xf32>
    %219 = arith.cmpf ogt, %217, %218 : vector<1x512xf32>
    %cst_175 = arith.constant 0xFF800000 : f32
    %220 = vector.shape_cast %219 : vector<1x512xi1> to vector<1x512xi1>
    %221 = vector.broadcast %220 : vector<1x512xi1> to vector<8x512xi1>
    %222 = vector.broadcast %cst_175 : f32 to vector<8x512xf32>
    %223 = arith.select %221, %216, %222 : vector<8x512xi1>, vector<8x512xf32>
    %224 = arith.maximumf %215, %223 : vector<8x512xf32>
    %c0_176 = arith.constant 0 : index
    %c32_177 = arith.constant 32 : index
    %225 = vector.load %arg16[%c0_176, %c32_177] : memref<8x546xf32, #tpu.memory_space<vmem>>, vector<8x512xf32>
    %c6_178 = arith.constant 6 : index
    %c0_179 = arith.constant 0 : index
    %226 = vector.load %arg11[%c6_178, %c0_179] : memref<9x512xf32, #tpu.memory_space<vmem>>, vector<1x512xf32>
    %cst_180 = arith.constant 5.000000e-01 : f32
    %227 = vector.broadcast %cst_180 : f32 to vector<1x512xf32>
    %228 = arith.cmpf ogt, %226, %227 : vector<1x512xf32>
    %cst_181 = arith.constant 0xFF800000 : f32
    %229 = vector.shape_cast %228 : vector<1x512xi1> to vector<1x512xi1>
    %230 = vector.broadcast %229 : vector<1x512xi1> to vector<8x512xi1>
    %231 = vector.broadcast %cst_181 : f32 to vector<8x512xf32>
    %232 = arith.select %230, %225, %231 : vector<8x512xi1>, vector<8x512xf32>
    %233 = arith.maximumf %224, %232 : vector<8x512xf32>
    %c0_182 = arith.constant 0 : index
    %c33_183 = arith.constant 33 : index
    %234 = vector.load %arg16[%c0_182, %c33_183] : memref<8x546xf32, #tpu.memory_space<vmem>>, vector<8x512xf32>
    %c7_184 = arith.constant 7 : index
    %c0_185 = arith.constant 0 : index
    %235 = vector.load %arg11[%c7_184, %c0_185] : memref<9x512xf32, #tpu.memory_space<vmem>>, vector<1x512xf32>
    %cst_186 = arith.constant 5.000000e-01 : f32
    %236 = vector.broadcast %cst_186 : f32 to vector<1x512xf32>
    %237 = arith.cmpf ogt, %235, %236 : vector<1x512xf32>
    %cst_187 = arith.constant 0xFF800000 : f32
    %238 = vector.shape_cast %237 : vector<1x512xi1> to vector<1x512xi1>
    %239 = vector.broadcast %238 : vector<1x512xi1> to vector<8x512xi1>
    %240 = vector.broadcast %cst_187 : f32 to vector<8x512xf32>
    %241 = arith.select %239, %234, %240 : vector<8x512xi1>, vector<8x512xf32>
    %242 = arith.maximumf %233, %241 : vector<8x512xf32>
    %c0_188 = arith.constant 0 : index
    %c34_189 = arith.constant 34 : index
    %243 = vector.load %arg16[%c0_188, %c34_189] : memref<8x546xf32, #tpu.memory_space<vmem>>, vector<8x512xf32>
    %c8_190 = arith.constant 8 : index
    %c0_191 = arith.constant 0 : index
    %244 = vector.load %arg11[%c8_190, %c0_191] : memref<9x512xf32, #tpu.memory_space<vmem>>, vector<1x512xf32>
    %cst_192 = arith.constant 5.000000e-01 : f32
    %245 = vector.broadcast %cst_192 : f32 to vector<1x512xf32>
    %246 = arith.cmpf ogt, %244, %245 : vector<1x512xf32>
    %cst_193 = arith.constant 0xFF800000 : f32
    %247 = vector.shape_cast %246 : vector<1x512xi1> to vector<1x512xi1>
    %248 = vector.broadcast %247 : vector<1x512xi1> to vector<8x512xi1>
    %249 = vector.broadcast %cst_193 : f32 to vector<8x512xf32>
    %250 = arith.select %248, %243, %249 : vector<8x512xi1>, vector<8x512xf32>
    %251 = arith.maximumf %242, %250 : vector<8x512xf32>
    %c0_194 = arith.constant 0 : index
    %c0_195 = arith.constant 0 : index
    %252 = vector.load %arg12[%c0_194, %c0_195] : memref<512x128xf32, #tpu.memory_space<vmem>>, vector<512x128xf32>
    %cst_196 = arith.constant dense<0.000000e+00> : vector<8x128xf32>
    %253 = tpu.matmul %251, %252, %cst_196 {dimension_numbers = #tpu.dot_dimension_numbers<[1], [0], [0], [1], [0, 0, 1, 1], [], []>} : vector<8x512xf32>, vector<512x128xf32>, vector<8x128xf32> -> vector<8x128xf32>
    %c0_197 = arith.constant 0 : index
    %c0_198 = arith.constant 0 : index
    %254 = vector.load %arg13[%c0_197, %c0_198] : memref<8x128xf32, #tpu.memory_space<vmem>>, vector<8x128xf32>
    tpu.vector_store %arg13[%c0_197, %c0_198], %253 {strides = array<i32>} : memref<8x128xf32, #tpu.memory_space<vmem>>, vector<8x128xf32>,
    return
  }
  func.func @transform_0(%arg0: i32) -> (i32, i32) {
    %c0_i32 = arith.constant 0 : i32
    %c0_i32_0 = arith.constant 0 : i32
    %c0_i32_1 = arith.constant 0 : i32
    return %c0_i32, %c0_i32_0 : i32, i32
  }
  func.func @transform_1(%arg0: i32) -> (i32, i32) {
    %c0_i32 = arith.constant 0 : i32
    %c0_i32_0 = arith.constant 0 : i32
    %c0_i32_1 = arith.constant 0 : i32
    return %c0_i32, %c0_i32_0 : i32, i32
  }
  func.func @transform_2(%arg0: i32) -> (i32, i32) {
    %c0_i32 = arith.constant 0 : i32
    %c0_i32_0 = arith.constant 0 : i32
    %c0_i32_1 = arith.constant 0 : i32
    return %c0_i32, %c0_i32_0 : i32, i32
  }
  func.func @transform_3(%arg0: i32) -> (i32, i32) {
    %c0_i32 = arith.constant 0 : i32
    %c0_i32_0 = arith.constant 0 : i32
    %c0_i32_1 = arith.constant 0 : i32
    return %c0_i32, %c0_i32_0 : i32, i32
  }
  func.func @transform_4(%arg0: i32) -> (i32, i32) {
    %c0_i32 = arith.constant 0 : i32
    %c0_i32_0 = arith.constant 0 : i32
    %c0_i32_1 = arith.constant 0 : i32
    return %c0_i32, %c0_i32_0 : i32, i32
  }
  func.func @transform_5(%arg0: i32) -> (i32, i32) {
    %c0_i32 = arith.constant 0 : i32
    %c0_i32_0 = arith.constant 0 : i32
    %c0_i32_1 = arith.constant 0 : i32
    return %c0_i32, %c0_i32_0 : i32, i32
  }
  func.func @transform_6(%arg0: i32) -> (i32, i32) {
    %c0_i32 = arith.constant 0 : i32
    %c0_i32_0 = arith.constant 0 : i32
    %c0_i32_1 = arith.constant 0 : i32
    return %c0_i32, %c0_i32_0 : i32, i32
  }
  func.func @transform_7(%arg0: i32) -> (i32, i32) {
    %c0_i32 = arith.constant 0 : i32
    %c0_i32_0 = arith.constant 0 : i32
    %c0_i32_1 = arith.constant 0 : i32
    return %c0_i32, %c0_i32_0 : i32, i32
  }
  func.func @transform_8(%arg0: i32) -> (i32, i32) {
    %c0_i32 = arith.constant 0 : i32
    %c0_i32_0 = arith.constant 0 : i32
    %c0_i32_1 = arith.constant 0 : i32
    return %c0_i32, %c0_i32_0 : i32, i32
  }
  func.func @transform_9(%arg0: i32) -> (i32, i32) {
    %c0_i32 = arith.constant 0 : i32
    %c0_i32_0 = arith.constant 0 : i32
    %c0_i32_1 = arith.constant 0 : i32
    return %c0_i32, %c0_i32_0 : i32, i32
  }
  func.func @transform_10(%arg0: i32) -> (i32, i32) {
    %c0_i32 = arith.constant 0 : i32
    %c0_i32_0 = arith.constant 0 : i32
    %c0_i32_1 = arith.constant 0 : i32
    return %c0_i32, %c0_i32_0 : i32, i32
  }
  func.func @transform_11(%arg0: i32) -> (i32, i32) {
    %c0_i32 = arith.constant 0 : i32
    %c0_i32_0 = arith.constant 0 : i32
    %c0_i32_1 = arith.constant 0 : i32
    return %c0_i32, %c0_i32_0 : i32, i32
  }
  func.func @transform_12(%arg0: i32) -> (i32, i32) {
    %c0_i32 = arith.constant 0 : i32
    %c0_i32_0 = arith.constant 0 : i32
    %c0_i32_1 = arith.constant 0 : i32
    return %c0_i32, %c0_i32_0 : i32, i32
  }
}

</mosaic_0001>

<bundles_post_ra>
// kernel: tpu_custom_call.1
= control target key start
LH: loop header
LB: loop body
LE: loop exit
PB: predicated region body
PF: predicated region fallthrough
CT: control target
= control target key end

     0   :  { %17 = vsyncpa [#allocation7], 0  ;;  %s4218_s0 = inlined_call_operand.hbm [shape: f32[4,512], index: 0, kind: input, shape index: {}]   ;;  %s4219_s1 = inlined_call_operand.hbm [shape: f32[8,36], index: 1, kind: input, shape index: {}]   ;;  %s4220_s2 = inlined_call_operand.vmem [shape: f32[8,1], index: 2, kind: input, shape index: {}]   ;;  %s4221_s3 = inlined_call_operand.vmem [shape: f32[8,1], index: 3, kind: input, shape index: {}]   ;;  %s4222_s4 = inlined_call_operand.vmem [shape: f32[8,1], index: 4, kind: input, shape index: {}]   ;;  %s4223_s5 = inlined_call_operand.hbm [shape: f32[8,72], index: 5, kind: input, shape index: {}]   ;;  %s4224_s6 = inlined_call_operand.vmem [shape: f32[8,1], index: 6, kind: input, shape index: {}]   ;;  %s4225_s7 = inlined_call_operand.vmem [shape: f32[8,1], index: 7, kind: input, shape index: {}]   ;;  %s4226_s8 = inlined_call_operand.vmem [shape: f32[8,1], index: 8, kind: input, shape index: {}]   ;;  %s4227_s9 = inlined_call_operand.vmem [shape: f32[9,512], index: 9, kind: input, shape index: {}]   ;;  %s4228_s10 = inlined_call_operand.hbm [shape: f32[9,512], index: 10, kind: input, shape index: {}]   ;;  %s4229_s11 = inlined_call_operand.hbm [shape: f32[512,128], index: 11, kind: input, shape index: {}]   ;;  %s4230_s12 = inlined_call_operand.hbm [shape: f32[8,128], index: 12, kind: output, shape index: {}]  }
   0x1   :  { %18 = vsyncpa [#allocation10], 0 }
   0x2   :  { %19 = vsyncpa [#allocation13], 0 }
   0x3   :  { %20 = vsyncpa [#allocation8], 0  ;;  %s2854_s21 = smov [#allocation9]   ;;  %s2855_s23 = smov [#allocation12]  }
   0x4   :  { %s37_s22 = sshll.u32 %s2854_s21, 4  ;;  %s70_s24 = sshll.u32 %s2855_s23, 4  ;;  %s38_s22 = int_to_ptr.vmem [resolvable:$true] %s37_s22  ;;  %s71_s24 = int_to_ptr.vmem [resolvable:$true] %s70_s24 }
   0x5   :  { %s2734_s25 = scalar_lea.vmem %s38_s22, 128  ;;  %p2739_p1 = scmp.lt.s32.totalorder %s38_s22, %s38_s22 }
   0x6   :  { %p2735_p0 = scmp.ne.s32.totalorder %s38_s22, %s2734_s25  ;;  %p2740_p2 = scmp.lt.s32.totalorder %s2734_s25, %s2734_s25 }
   0x8   :  { %p2741_p3 = por %p2740_p2, %p2739_p1 }
   0xa   :  { %p2742_p4 = pnand %p2741_p3, %p2735_p0 }
   0xc   :  { %2745 = shalt.err (!%p2742_p4)
}
   0xd   :  { %40 = dma.hbm_to_vmem [thread:$0]  %s4219_s1, 128, %s38_s22, [#allocation10]  }
   0xe   :  { %s2754_s28 = scalar_lea.vmem %s71_s24, 1024  ;;  %p2759_p6 = scmp.lt.s32.totalorder %s71_s24, %s71_s24 }
   0xf   :  { %p2755_p5 = scmp.ne.s32.totalorder %s71_s24, %s2754_s28  ;;  %p2760_p7 = scmp.lt.s32.totalorder %s2754_s28, %s2754_s28 }
  0x11   :  { %p2761_p8 = por %p2760_p7, %p2759_p6 }
  0x13   :  { %p2762_p9 = pnand %p2761_p8, %p2755_p5 }
  0x15   :  { %2765 = shalt.err (!%p2762_p9)
}
  0x16   :  { %s2856_s29 = smov 512   ;;  %s2857_s30 = smov 32  }
  0x17   :  { %76 = dma.hbm_to_vmem [thread:$0]  %s4228_s10, 1024, %s71_s24, [#allocation13], %s2856_s29, %s2856_s29, %s2857_s30  }
  0x18   :  { %s2858_s15 = smov [#allocation6]   ;;  %s2859_s17 = smov [#allocation11]  }
  0x19   :  { %s27_s16 = sshll.u32 %s2858_s15, 4  ;;  %s53_s18 = sshll.u32 %s2859_s17, 4  ;;  %s28_s16 = int_to_ptr.vmem [resolvable:$true] %s27_s16  ;;  %s54_s18 = int_to_ptr.vmem [resolvable:$true] %s53_s18 }
  0x1a   :  { %s2774_s1 = scalar_lea.vmem %s28_s16, 256  ;;  %p2779_p11 = scmp.lt.s32.totalorder %s28_s16, %s28_s16 }
  0x1b   :  { %p2775_p10 = scmp.ne.s32.totalorder %s28_s16, %s2774_s1  ;;  %p2780_p12 = scmp.lt.s32.totalorder %s2774_s1, %s2774_s1 }
  0x1d   :  { %p2781_p13 = por %p2780_p12, %p2779_p11 }
  0x1f   :  { %p2782_p0 = pnand %p2781_p13, %p2775_p10 }
  0x21   :  { %2785 = shalt.err (!%p2782_p0)
}
  0x22   :  { %30 = dma.hbm_to_vmem [thread:$0]  %s4218_s0, 256, %s28_s16, [#allocation7]  }
  0x23   :  { %s2794_s21 = scalar_lea.vmem %s54_s18, 128  ;;  %p2799_p2 = scmp.lt.s32.totalorder %s54_s18, %s54_s18 }
  0x24   :  { %p2795_p1 = scmp.ne.s32.totalorder %s54_s18, %s2794_s21  ;;  %p2800_p3 = scmp.lt.s32.totalorder %s2794_s21, %s2794_s21 }
  0x26   :  { %p2801_p4 = por %p2800_p3, %p2799_p2 }
  0x28   :  { %p2802_p5 = pnand %p2801_p4, %p2795_p1 }
  0x2a   :  { %2805 = shalt.err (!%p2802_p5)
}
  0x2b   :  { %56 = dma.hbm_to_vmem [thread:$0]  %s4223_s5, 128, %s54_s18, [#allocation10]  }
  0x2c   :  { %s2860_s23 = smov [#allocation14]  }
  0x2d   :  { %s82_s24 = sshll.u32 %s2860_s23, 4  ;;  %s83_s24 = int_to_ptr.vmem [resolvable:$true] %s82_s24 }
  0x2e   :  { %s2814_s25 = scalar_lea.vmem %s83_s24, 8192  ;;  %p2819_p7 = scmp.lt.s32.totalorder %s83_s24, %s83_s24 }
  0x2f   :  { %p2815_p6 = scmp.ne.s32.totalorder %s83_s24, %s2814_s25  ;;  %p2820_p8 = scmp.lt.s32.totalorder %s2814_s25, %s2814_s25 }
  0x31   :  { %p2821_p9 = por %p2820_p8, %p2819_p7 }
  0x33   :  { %p2822_p10 = pnand %p2821_p9, %p2815_p6 }
  0x35   :  { %2825 = shalt.err (!%p2822_p10)
}
  0x36   :  { %s2861_s0 = smov 128   ;;  %s2862_s26 = smov 8  }
  0x37   :  { %88 = dma.hbm_to_vmem [thread:$0]  %s4229_s11, 8192, %s83_s24, [#allocation13], %s2861_s0, %s2861_s0, %s2862_s26  }
  0x38   :  { %2846 = dma.done.wait [#allocation7], 256  }
  0x39   :  { %2847 = vsyncadd [#allocation7], 4294967040 }
  0x3a   :  { %2848 = dma.done.wait [#allocation10], 256  }
  0x3b   :  { %2849 = vsyncadd [#allocation10], 4294967040 }
  0x3c   :  { %2850 = dma.done.wait [#allocation13], 9216  }
  0x3d   :  { %2851 = vsyncadd [#allocation13], 4294958080  ;;  %v136_v0 = vlaneseq  ;;  %vm106_vm0 = vcmask 134144   ;;  %v2863_v1 = vmov 0.0   ;;  %vm118_vm1 = vcmask 138240   ;;  %v104_v7 = vld [vmem:[#allocation6] sm:$0xff] }
  0x3e   :  { %107 = vst.msk [vmem:[#allocation2] sm:$0xf] %vm106_vm0, %v2863_v1  ;;  %822 = vmatprep.mubr.f32.mxu0 %v2863_v1  ;;  %893 = vmatprep.mubr.f32.mxu1 %v2863_v1  ;;  %vm108_vm2 = vcmask 273544   ;;  %v2526_v8 = vld [vmem:[%s4227_s9 + $0x20] ss:$8 sm:$0xf] }
  0x3f   :  { %v137_v2 = vshrl.u32 %v136_v0, 7  ;;  %958 = vst.msk [vmem:[#allocation4] sm:$0xff] %vm118_vm1, %v2863_v1  ;;  %s2864_s29 = smov 17   ;;  %v2525_v11 = vld [vmem:[%s4227_s9 + $0x7] ss:$8 sm:$0xf] }
  0x40   :  { %109 = vst.msk [vmem:[#allocation2 + $0x10] sm:$0xf] %vm108_vm2, %v2863_v1  ;;  %112 = vrot.lane.b32.xlu0 %v104_v7, %s2864_s29  ;;  %v2524_v12 = vld [vmem:[%s4227_s9 + $0x6] ss:$8 sm:$0xf]  ;;  %s2865_s17 = smov 34  }
  0x41   :  { %v2969_v3 = vsub.s32 0, %v137_v2  ;;  %v2971_v4 = vsub.s32 1, %v137_v2  ;;  %v2973_v5 = vsub.s32 2, %v137_v2  ;;  %v2975_v6 = vsub.s32 3, %v137_v2  ;;  %v105_v13 = vld [vmem:[#allocation6 + $0x8] sm:$0xff]  ;;  %s2866_s19 = smov 33  }
  0x42   :  { %v2523_v25 = vld [vmem:[%s4227_s9 + $0x5] ss:$8 sm:$0xf]  ;;  %v2522_v32 = vld [vmem:[%s4227_s9 + $0x4] ss:$8 sm:$0xf] }
  0x43   :  { %v656_v9 = vrot.slane %v2526_v8, %v2969_v3  ;;  %v660_v10 = vrot.slane %v2526_v8, %v2971_v4  ;;  %v587_v14 = vrot.slane %v2525_v11, %v2969_v3  ;;  %v591_v15 = vrot.slane %v2525_v11, %v2971_v4  ;;  %v2521_v39 = vld [vmem:[%s4227_s9 + $0x3] ss:$8 sm:$0xf]  ;;  %s2867_s23 = smov 18   ;;  %s2868_s27 = smov 16  }
  0x44   :  { %v595_v16 = vrot.slane %v2525_v11, %v2973_v5  ;;  %v599_v17 = vrot.slane %v2525_v11, %v2975_v6  ;;  %v664_v19 = vrot.slane %v2526_v8, %v2973_v5  ;;  %v668_v20 = vrot.slane %v2526_v8, %v2975_v6  ;;  %114 = vrot.lane.b32.xlu0 %v105_v13, %s2864_s29  ;;  %v2520_v46 = vld [vmem:[%s4227_s9 + $0x2] ss:$8 sm:$0xf]  ;;  %v2519_v53 = vld [vmem:[%s4227_s9 + $0x1] ss:$8 sm:$0xf] }
  0x45   :  { %v669_v18 = vcombine.low %v656_v9, %v660_v10  ;;  %v519_v21 = vrot.slane %v2524_v12, %v2969_v3  ;;  %v600_v22 = vcombine.low %v587_v14, %v591_v15  ;;  %v523_v24 = vrot.slane %v2524_v12, %v2971_v4  ;;  %s2869_s28 = smov 2   ;;  %s2870_s5 = smov 1   ;;  %v134_v2 = vld [vmem:[%s4227_s9] ss:$8 sm:$0xf] }
  0x46   :  { %v601_v23 = vcombine.low %v595_v16, %v599_v17  ;;  %v670_v26 = vcombine.low %v664_v19, %v668_v20  ;;  %v450_v27 = vrot.slane %v2523_v25, %v2969_v3  ;;  %v454_v28 = vrot.slane %v2523_v25, %v2971_v4  ;;  %s2871_s14 = smov 94   ;;  %s2872_s15 = smov 96  }
  0x47   :  { %671 = vrot.lane.b32.xlu1 %v669_v18, %s2865_s17  ;;  %v532_v29 = vcombine.low %v519_v21, %v523_v24  ;;  %v458_v30 = vrot.slane %v2523_v25, %v2973_v5  ;;  %v462_v31 = vrot.slane %v2523_v25, %v2975_v6  ;;  %v527_v34 = vrot.slane %v2524_v12, %v2973_v5  ;;  %s2873_s16 = smov 111   ;;  %s2874_s18 = smov 126  }
  0x48   :  { %604 = vrot.lane.b32.xlu0 %v601_v23, %s2866_s19  ;;  %v463_v33 = vcombine.low %v450_v27, %v454_v28  ;;  %v531_v35 = vrot.slane %v2524_v12, %v2975_v6  ;;  %v383_v37 = vrot.slane %v2522_v32, %v2969_v3  ;;  %v387_v38 = vrot.slane %v2522_v32, %v2971_v4  ;;  %s2875_s1 = smov 95   ;;  %s2876_s20 = smov 110  }
  0x49   :  { %v464_v36 = vcombine.low %v458_v30, %v462_v31  ;;  %v314_v41 = vrot.slane %v2521_v39, %v2969_v3  ;;  %v318_v42 = vrot.slane %v2521_v39, %v2971_v4  ;;  %v322_v44 = vrot.slane %v2521_v39, %v2973_v5  ;;  %s2877_s21 = smov 112   ;;  %s2878_s10 = smov 127  }
  0x4a   :  { %v533_v40 = vcombine.low %v527_v34, %v531_v35  ;;  %v396_v43 = vcombine.low %v383_v37, %v387_v38  ;;  %v326_v45 = vrot.slane %v2521_v39, %v2975_v6  ;;  %v391_v48 = vrot.slane %v2522_v32, %v2973_v5 }
  0x4b   :  { %602 = vrot.lane.b32.xlu1 %v600_v22, %s2866_s19  ;;  %v327_v47 = vcombine.low %v314_v41, %v318_v42  ;;  %v395_v49 = vrot.slane %v2522_v32, %v2975_v6  ;;  %v246_v51 = vrot.slane %v2520_v46, %v2969_v3  ;;  %v250_v52 = vrot.slane %v2520_v46, %v2971_v4 }
  0x4c   :  { %534 = vrot.lane.b32.xlu0 %v532_v29, %s2857_s30  ;;  %v328_v50 = vcombine.low %v322_v44, %v326_v45  ;;  %v177_v55 = vrot.slane %v2519_v53, %v2969_v3  ;;  %v181_v56 = vrot.slane %v2519_v53, %v2971_v4  ;;  %v185_v58 = vrot.slane %v2519_v53, %v2973_v5 }
  0x4d   :  { %v397_v54 = vcombine.low %v391_v48, %v395_v49  ;;  %v259_v57 = vcombine.low %v246_v51, %v250_v52  ;;  %v189_v59 = vrot.slane %v2519_v53, %v2975_v6  ;;  %v254_v60 = vrot.slane %v2520_v46, %v2973_v5 }
  0x4e   :  { %v190_v61 = vcombine.low %v177_v55, %v181_v56  ;;  %v258_v63 = vrot.slane %v2520_v46, %v2975_v6  ;;  %vm126_vm3 = vcmask 1043592   ;;  %vm127_vm4 = vcmask 1047556  }
  0x4f   :  { %673 = vrot.lane.b32.xlu1 %v670_v26, %s2865_s17  ;;  %v191_v62 = vcombine.low %v185_v58, %v189_v59  ;;  %vm128_vm5 = vmor %vm127_vm4, %vm126_vm3  ;;  %v147_v9 = vrot.slane %v134_v2, %v2973_v5  ;;  %v151_v10 = vrot.slane %v134_v2, %v2975_v6  ;;  %vm120_vm6 = vcmask 1043456  }
  0x50   :  { %467 = vrot.lane.b32.xlu0 %v464_v36, %s2867_s23  ;;  %v260_v0 = vcombine.low %v254_v60, %v258_v63  ;;  %v139_v14 = vrot.slane %v134_v2, %v2969_v3  ;;  %v143_v15 = vrot.slane %v134_v2, %v2971_v4  ;;  %vm677_vm7 = vcmask 277504  }
  0x51   :  { %v153_v16 = vcombine.low %v147_v9, %v151_v10  ;;  %vm540_vm8 = vcmask 261120   ;;  %vm608_vm9 = vcmask 269312   ;;  %vm267_vm10 = vcmask 15360  }
  0x52   :  { %v152_v22 = vcombine.low %v139_v14, %v143_v15  ;;  %vm471_vm11 = vcmask 146432   ;;  %vm335_vm12 = vcmask 130048   ;;  %vm198_vm13 = vcmask 7168  }
  0x53   :  { %465 = vrot.lane.b32.xlu1 %v463_v33, %s2867_s23  ;;  %vm4235_vm14 = vcmask 769024   ;;  %vm4236_vm15 = vcmask 777216   ;;  %vm4231_vm2 = vcmask 916480   ;;  %vm4237_vm3 = vcmask 785408  }
  0x54   :  { %398 = vrot.lane.b32.xlu0 %v396_v43, %s2864_s29  ;;  %vm4234_vm4 = vcmask 908288  }
  0x57   :  { %536 = vrot.lane.b32.xlu1 %v533_v40, %s2857_s30 }
  0x58   :  { %331 = vrot.lane.b32.xlu0 %v328_v50, %s2868_s27 }
  0x5b   :  { %329 = vrot.lane.b32.xlu1 %v327_v47, %s2868_s27 }
  0x5c   :  { %261 = vrot.lane.b32.xlu0 %v259_v57, %s2869_s28 }
  0x5f   :  { %400 = vrot.lane.b32.xlu1 %v397_v54, %s2864_s29 }
  0x60   :  { %194 = vrot.lane.b32.xlu0 %v191_v62, %s2870_s5 }
  0x63   :  { %192 = vrot.lane.b32.xlu1 %v190_v61, %s2870_s5 }
  0x67   :  { %263 = vrot.lane.b32.xlu1 %v260_v0, %s2869_s28 }
  0xb2   :  { %v113_v7 = vpop.permute.xlu0 %112 }
  0xb3   :  { %v116_v8 = vrot.slane %v113_v7, 4 }
  0xb5   :  { %v119_v11 = vsel %vm118_vm1, %v116_v8, %v113_v7 }
  0xb6   :  { %129 = vst.msk [vmem:[#allocation2] sm:$0xff] %vm128_vm5, %v119_v11  ;;  %v115_v13 = vpop.permute.xlu0 %114  ;;  %vm4233_vm5 = vcmask 1039360  }
  0xb7   :  { %v117_v17 = vrot.slane %v115_v13, 4 }
  0xb9   :  { %v3057_v12 = vpop.permute.xlu1 %671  ;;  %v121_v18 = vsel %vm120_vm6, %v116_v8, %v117_v17  ;;  %131 = vst.msk [vmem:[#allocation2 + $0x10] sm:$0xf] %vm106_vm0, %v117_v17  ;;  %vm4238_vm0 = vcmask 900096  }
  0xba   :  { %v3064_v19 = vsel %vm118_vm1, %v121_v18, %v115_v13  ;;  %v3068_v21 = vpop.permute.xlu0 %604  ;;  %v675_v45 = vrot.slane %v3057_v12, 4 }
  0xbb   :  { %v157_v23 = vmul.f32 %v153_v16, %v3064_v19  ;;  %v607_v14 = vrot.slane %v3068_v21, 4 }
  0xbc   :  { %v678_v51 = vsel %vm677_vm7, %v675_v45, %v3057_v12 }
  0xbd   :  { %v3066_v20 = vpop.permute.xlu1 %602  ;;  %166 = vst [vmem:[#allocation3 + $0x50] sm:$0xf] %v157_v23  ;;  %v3071_v24 = vld [vmem:[#allocation2] sm:$0xff]  ;;  %v161_v25 = vcombine.high %v157_v23, %v157_v23 }
  0xbe   :  { %v156_v27 = vmul.f32 %v3071_v24, %v152_v22  ;;  %v535_v29 = vpop.permute.xlu0 %534  ;;  %v3099_v52 = vmul.f32 %v678_v51, %v3071_v24  ;;  %v606_v53 = vrot.slane %v3066_v20, 4 }
  0xbf   :  { %167 = vst [vmem:[#allocation3 + $0x18] sm:$0xf] %v161_v25  ;;  %v538_v43 = vrot.slane %v535_v29, 4 }
  0xc0   :  { %v649_v30 = vld [vmem:[#allocation2 + $0x10] sm:$0xf]  ;;  %v160_v31 = vcombine.high %v156_v27, %v156_v27  ;;  %164 = vst [vmem:[#allocation3] sm:$0xf] %v156_v27  ;;  %v609_v63 = vsel %vm608_vm9, %v606_v53, %v3066_v20 }
  0xc1   :  { %v3073_v26 = vpop.permute.xlu1 %673  ;;  %v512_v36 = vld [vmem:[#allocation2 + $0x10] sm:$0xf]  ;;  %v615_v7 = vmul.f32 %v3071_v24, %v609_v63  ;;  %v541_v9 = vsel %vm540_vm8, %v538_v43, %v535_v29 }
  0xc2   :  { %v676_v28 = vrot.slane %v3073_v26, 4  ;;  %165 = vst [vmem:[#allocation3 + $0x38] sm:$0xf] %v160_v31  ;;  %v3082_v34 = vpop.permute.xlu0 %467  ;;  %v376_v42 = vld [vmem:[#allocation2 + $0x10] sm:$0xf]  ;;  %v3130_v15 = vmul.f32 %v3071_v24, %v541_v9 }
  0xc3   :  { %v239_v56 = vld [vmem:[#allocation2 + $0x10] sm:$0xf]  ;;  %v470_v23 = vrot.slane %v3082_v34, 4 }
  0xc4   :  { %v686_v32 = vmul.f32 %v676_v28, %v649_v30  ;;  %v580_v13 = vld [vmem:[#allocation2 + $0x10] sm:$0xf] }
  0xc5   :  { %v3079_v33 = vpop.permute.xlu1 %465  ;;  %v617_v17 = vmul.f32 %v607_v14, %v580_v13  ;;  %v443_v22 = vld [vmem:[#allocation2 + $0x10] sm:$0xf] }
  0xc6   :  { %700 = vrot.lane.b32.xlu0 %v686_v32, %s2871_s14  ;;  %v399_v40 = vpop.permute.xlu0 %398  ;;  %v469_v10 = vrot.slane %v3079_v33, 4  ;;  %v480_v31 = vmul.f32 %v470_v23, %v443_v22  ;;  %v2879_v22 = vmov 0  }
  0xc7   :  { %v402_v50 = vrot.slane %v399_v40, 4  ;;  %v623_v30 = vcombine.low %v617_v17, %v617_v17  ;;  %2640 = vset.pattern.permute.xlu0 %v2879_v22  ;;  %2641 = vset.pattern.permute.xlu1 %v2879_v22 }
  0xc8   :  { %v472_v18 = vsel %vm471_vm11, %v469_v10, %v3079_v33 }
  0xc9   :  { %v537_v35 = vpop.permute.xlu1 %536  ;;  %v478_v29 = vmul.f32 %v3071_v24, %v472_v18  ;;  %v404_v32 = vsel %vm118_vm1, %v402_v50, %v399_v40  ;;  %v736_v18 = vld [vmem:[%s4220_s2] sm:$0xff] }
  0xca   :  { %v539_v37 = vrot.slane %v537_v35, 4  ;;  %v3088_v47 = vpop.permute.xlu0 %331 }
  0xcb   :  { %v334_v27 = vrot.slane %v3088_v47, 4  ;;  %v484_v12 = vcombine.low %v478_v29, %v478_v29 }
  0xcc   :  { %v549_v38 = vmul.f32 %v539_v37, %v512_v36  ;;  %v542_v49 = vsel %vm120_vm6, %v538_v43, %v539_v37  ;;  %v486_v36 = vcombine.low %v480_v31, %v480_v31 }
  0xcd   :  { %v3084_v39 = vpop.permute.xlu1 %329  ;;  %v543_v54 = vsel %vm540_vm8, %v542_v49, %v537_v35  ;;  %v410_v35 = vmul.f32 %v3071_v24, %v404_v32  ;;  %v621_v49 = vcombine.low %v615_v7, %v615_v7 }
  0xce   :  { %563 = vrot.lane.b32.xlu0 %v549_v38, %s2872_s15  ;;  %v262_v59 = vpop.permute.xlu0 %261  ;;  %v3107_v62 = vmul.f32 %v543_v54, %v3064_v19  ;;  %v333_v25 = vrot.slane %v3084_v39, 4  ;;  %v307_v54 = vld [vmem:[#allocation2 + $0x10] sm:$0xf] }
  0xcf   :  { %v265_v60 = vrot.slane %v262_v59, 4 }
  0xd0   :  { %v337_v33 = vsel %vm120_vm6, %v333_v25, %v334_v27  ;;  %v336_v37 = vsel %vm335_vm12, %v333_v25, %v3084_v39  ;;  %v690_v39 = vcombine.high %v3099_v52, %v3099_v52  ;;  %v554_v13 = vcombine.high %v3107_v62, %v3107_v62 }
  0xd1   :  { %v401_v41 = vpop.permute.xlu1 %400  ;;  %v338_v38 = vsel %vm335_vm12, %v337_v33, %v3088_v47  ;;  %v342_v40 = vmul.f32 %v3071_v24, %v336_v37  ;;  %v679_v47 = vsel %vm120_vm6, %v675_v45, %v676_v28 }
  0xd2   :  { %v403_v44 = vrot.slane %v401_v41, 4  ;;  %v680_v51 = vsel %vm677_vm7, %v679_v47, %v3073_v26  ;;  %v195_v20 = vpop.permute.xlu0 %194 }
  0xd3   :  { %v685_v28 = vmul.f32 %v680_v51, %v3064_v19  ;;  %v348_v26 = vcombine.low %v342_v40, %v342_v40 }
  0xd4   :  { %v412_v46 = vmul.f32 %v403_v44, %v376_v42  ;;  %v405_v57 = vsel %vm120_vm6, %v402_v50, %v403_v44  ;;  %v268_v42 = vsel %vm267_vm10, %v265_v60, %v262_v59 }
  0xd5   :  { %v3090_v48 = vpop.permute.xlu1 %192  ;;  %v406_v0 = vsel %vm118_vm1, %v405_v57, %v401_v41  ;;  %v343_v41 = vmul.f32 %v338_v38, %v3064_v19  ;;  %v274_v44 = vmul.f32 %v3071_v24, %v268_v42  ;;  %v344_v57 = vmul.f32 %v334_v27, %v307_v54 }
  0xd6   :  { %426 = vrot.lane.b32.xlu0 %v412_v46, %s2873_s16  ;;  %v3120_v8 = vmul.f32 %v406_v0, %v3064_v19  ;;  %v196_v43 = vrot.slane %v3090_v48, 4  ;;  %v553_v0 = vcombine.high %v3130_v15, %v3130_v15 }
  0xd7   :  { %v349_v63 = vcombine.low %v343_v41, %v343_v41  ;;  %v280_v9 = vcombine.high %v274_v44, %v274_v44 }
  0xd8   :  { %v199_v46 = vsel %vm198_vm13, %v196_v43, %v3090_v48  ;;  %v610_v48 = vsel %vm120_vm6, %v606_v53, %v607_v14  ;;  %v170_v14 = vld [vmem:[#allocation2 + $0x10] sm:$0xf] }
  0xd9   :  { %v264_v55 = vpop.permute.xlu1 %263  ;;  %v205_v50 = vmul.f32 %v3071_v24, %v199_v46  ;;  %v611_v45 = vsel %vm608_vm9, %v610_v48, %v3068_v21  ;;  %v473_v24 = vsel %vm120_vm6, %v469_v10, %v470_v23 }
  0xda   :  { %v266_v58 = vrot.slane %v264_v55, 4  ;;  %692 = vrot.lane.b32.xlu0 %v3099_v52, %s2871_s14  ;;  %v616_v52 = vmul.f32 %v611_v45, %v3064_v19  ;;  %v474_v53 = vsel %vm471_vm11, %v473_v24, %v3082_v34 }
  0xdc   :  { %v276_v61 = vmul.f32 %v266_v58, %v239_v56  ;;  %v269_v2 = vsel %vm120_vm6, %v265_v60, %v266_v58  ;;  %v622_v21 = vcombine.low %v616_v52, %v616_v52  ;;  %v479_v56 = vmul.f32 %v474_v53, %v3064_v19 }
  0xdd   :  { %v270_v11 = vsel %vm267_vm10, %v269_v2, %v264_v55  ;;  %v197_v55 = vrot.slane %v195_v20, 4  ;;  %v350_v60 = vcombine.low %v344_v57, %v344_v57  ;;  %v416_v2 = vcombine.high %v410_v35, %v410_v35 }
  0xde   :  { %290 = vrot.lane.b32.xlu1 %v276_v61, %s2874_s18  ;;  %559 = vrot.lane.b32.xlu0 %v3107_v62, %s2872_s15  ;;  %v3133_v16 = vmul.f32 %v270_v11, %v3064_v19  ;;  %v485_v59 = vcombine.low %v479_v56, %v479_v56  ;;  %v691_v11 = vcombine.high %v685_v28, %v685_v28 }
  0xdf   :  { %v200_v58 = vsel %vm120_vm6, %v196_v43, %v197_v55 }
  0xe0   :  { %v201_v34 = vsel %vm198_vm13, %v200_v58, %v195_v20  ;;  %v281_v10 = vcombine.high %v3133_v16, %v3133_v16 }
  0xe1   :  { %v206_v61 = vmul.f32 %v201_v34, %v3064_v19  ;;  %v211_v19 = vcombine.low %v205_v50, %v205_v50 }
  0xe2   :  { %626 = vrot.lane.b32.xlu1 %v615_v7, %s2875_s1  ;;  %422 = vrot.lane.b32.xlu0 %v3120_v8, %s2873_s16 }
  0xe3   :  { %v212_v7 = vcombine.low %v206_v61, %v206_v61 }
  0xe6   :  { %555 = vrot.lane.b32.xlu1 %v3130_v15, %s2872_s15  ;;  %286 = vrot.lane.b32.xlu0 %v3133_v16, %s2874_s18  ;;  %v417_v15 = vcombine.high %v3120_v8, %v3120_v8  ;;  %v207_v16 = vmul.f32 %v197_v55, %v170_v14 }
  0xe8   :  { %v213_v17 = vcombine.low %v207_v16, %v207_v16 }
  0xea   :  { %489 = vrot.lane.b32.xlu1 %v478_v29, %s2876_s20  ;;  %632 = vrot.lane.b32.xlu0 %v623_v30, %s2875_s1 }
  0xee   :  { %418 = vrot.lane.b32.xlu1 %v410_v35, %s2873_s16  ;;  %495 = vrot.lane.b32.xlu0 %v486_v36, %s2876_s20 }
  0xf2   :  { %353 = vrot.lane.b32.xlu1 %v342_v40, %s2877_s21  ;;  %357 = vrot.lane.b32.xlu0 %v343_v41, %s2877_s21 }
  0xf6   :  { %694 = vrot.lane.b32.xlu0 %v690_v39, %s2871_s14  ;;  %282 = vrot.lane.b32.xlu1 %v274_v44, %s2874_s18 }
  0xfa   :  { %624 = vrot.lane.b32.xlu0 %v621_v49, %s2875_s1  ;;  %216 = vrot.lane.b32.xlu1 %v205_v50, %s2878_s10 }
  0xfe   :  { %487 = vrot.lane.b32.xlu0 %v484_v12, %s2876_s20  ;;  %696 = vrot.lane.b32.xlu1 %v685_v28, %s2871_s14 }
 0x102   :  { %351 = vrot.lane.b32.xlu0 %v348_v26, %s2877_s21  ;;  %630 = vrot.lane.b32.xlu1 %v616_v52, %s2875_s1 }
 0x106   :  { %628 = vrot.lane.b32.xlu0 %v622_v21, %s2875_s1  ;;  %493 = vrot.lane.b32.xlu1 %v479_v56, %s2876_s20 }
 0x10a   :  { %491 = vrot.lane.b32.xlu0 %v485_v59, %s2876_s20  ;;  %359 = vrot.lane.b32.xlu1 %v350_v60, %s2877_s21 }
 0x10e   :  { %355 = vrot.lane.b32.xlu0 %v349_v63, %s2877_s21  ;;  %557 = vrot.lane.b32.xlu1 %v553_v0, %s2872_s15 }
 0x112   :  { %420 = vrot.lane.b32.xlu1 %v416_v2, %s2873_s16  ;;  %218 = vrot.lane.b32.xlu0 %v212_v7, %s2878_s10 }
 0x116   :  { %284 = vrot.lane.b32.xlu1 %v280_v9, %s2874_s18  ;;  %288 = vrot.lane.b32.xlu0 %v281_v10, %s2874_s18 }
 0x11a   :  { %214 = vrot.lane.b32.xlu1 %v211_v19, %s2878_s10  ;;  %220 = vrot.lane.b32.xlu0 %v206_v61, %s2878_s10 }
 0x11e   :  { %698 = vrot.lane.b32.xlu1 %v691_v11, %s2871_s14  ;;  %739 = vperm.xlu0 %2640, %v736_v18  }
 0x122   :  { %561 = vrot.lane.b32.xlu1 %v554_v13, %s2872_s15 }
 0x126   :  { %424 = vrot.lane.b32.xlu1 %v417_v15, %s2873_s16 }
 0x12a   :  { %222 = vrot.lane.b32.xlu1 %v213_v17, %s2878_s10 }
 0x138   :  { %v3226_v62 = vpop.permute.xlu0 %700 }
 0x140   :  { %v3228_v23 = vpop.permute.xlu0 %563 }
 0x148   :  { %v3230_v8 = vpop.permute.xlu0 %426 }
 0x14c   :  { %v693_v25 = vpop.permute.xlu0 %692 }
 0x150   :  { %v3232_v27 = vpop.permute.xlu1 %290  ;;  %v3234_v29 = vpop.permute.xlu0 %559 }
 0x154   :  { %v627_v30 = vpop.permute.xlu1 %626  ;;  %v3236_v31 = vpop.permute.xlu0 %422 }
 0x158   :  { %v556_v32 = vpop.permute.xlu1 %555  ;;  %v3238_v33 = vpop.permute.xlu0 %286 }
 0x15c   :  { %v490_v35 = vpop.permute.xlu1 %489  ;;  %v633_v36 = vpop.permute.xlu0 %632 }
 0x160   :  { %v3240_v37 = vpop.permute.xlu1 %418  ;;  %v496_v38 = vpop.permute.xlu0 %495 }
 0x164   :  { %v354_v40 = vpop.permute.xlu1 %353  ;;  %v358_v41 = vpop.permute.xlu0 %357 }
 0x168   :  { %v3242_v42 = vpop.permute.xlu1 %282  ;;  %v695_v43 = vpop.permute.xlu0 %694 }
 0x169   :  { %v703_v39 = vsel %vm4235_vm14, %v693_v25, %v695_v43 }
 0x16a   :  { %711 = vst [vmem:[#allocation3 + $0x20] sm:$0xf] %v703_v39 }
 0x16c   :  { %v3245_v44 = vpop.permute.xlu1 %216  ;;  %v625_v46 = vpop.permute.xlu0 %624 }
 0x16d   :  { %v635_v47 = vsel %vm4236_vm15, %v625_v46, %v627_v30 }
 0x16e   :  { %643 = vst [vmem:[#allocation3 + $0x58] sm:$0xf0] %v635_v47  ;;  %v715_v47 = vld [vmem:[#allocation9] sm:$0xff] }
 0x170   :  { %v3248_v49 = vpop.permute.xlu1 %696  ;;  %v488_v50 = vpop.permute.xlu0 %487 }
 0x171   :  { %v704_v51 = vsel %vm4235_vm14, %v695_v43, %v3248_v49  ;;  %v498_v48 = vsel %vm4238_vm0, %v488_v50, %v490_v35  ;;  %v732_v21 = vld [vmem:[#allocation3 + $0x20] sm:$0xf] }
 0x172   :  { %712 = vst [vmem:[#allocation3 + $0x48] sm:$0xf] %v704_v51  ;;  %506 = vst [vmem:[#allocation3 + $0x8] sm:$0xf0] %v498_v48 }
 0x174   :  { %v631_v12 = vpop.permute.xlu1 %630  ;;  %v352_v28 = vpop.permute.xlu0 %351 }
 0x175   :  { %v638_v45 = vsel %vm4236_vm15, %v631_v12, %v633_v36  ;;  %v362_v24 = vsel %vm4231_vm2, %v352_v28, %v354_v40 }
 0x176   :  { %646 = vst [vmem:[#allocation3 + $0x60] sm:$0xf0] %v638_v45  ;;  %370 = vst [vmem:[#allocation3 + $0x30] sm:$0xf0] %v362_v24 }
 0x178   :  { %v494_v20 = vpop.permute.xlu1 %493  ;;  %v629_v26 = vpop.permute.xlu0 %628 }
 0x179   :  { %v501_v52 = vsel %vm4238_vm0, %v494_v20, %v496_v38  ;;  %v636_v53 = vsel %vm4236_vm15, %v627_v30, %v629_v26  ;;  %v637_v54 = vsel %vm4236_vm15, %v629_v26, %v631_v12  ;;  %v733_v55 = vld [vmem:[#allocation3 + $0x48] sm:$0xf] }
 0x17a   :  { %509 = vst [vmem:[#allocation3 + $0x40] sm:$0xf0] %v501_v52  ;;  %644 = vst [vmem:[#allocation3 + $0x10] sm:$0xf0] %v636_v53  ;;  %2527 = vmatprep.subr.msk.mxu0 %vm120_vm6, %v733_v55 }
 0x17b   :  { %645 = vst [vmem:[#allocation3 + $0x98] sm:$0xf0] %v637_v54  ;;  %2528 = vmatpush1.msk.msra.mxu0 %vm120_vm6, %v732_v21 }
 0x17c   :  { %v360_v56 = vpop.permute.xlu1 %359  ;;  %v492_v57 = vpop.permute.xlu0 %491 }
 0x17d   :  { %v365_v58 = vsel %vm4231_vm2, %v358_v41, %v360_v56  ;;  %v499_v59 = vsel %vm4238_vm0, %v490_v35, %v492_v57  ;;  %v500_v60 = vsel %vm4238_vm0, %v492_v57, %v494_v20 }
 0x17e   :  { %373 = vst [vmem:[#allocation3 + $0x80] sm:$0xf0] %v365_v58  ;;  %507 = vst [vmem:[#allocation3 + $0x88] sm:$0xf0] %v499_v59 }
 0x17f   :  { %508 = vst [vmem:[#allocation3 + $0x28] sm:$0xf0] %v500_v60 }
 0x180   :  { %v558_v34 = vpop.permute.xlu1 %557  ;;  %v356_v61 = vpop.permute.xlu0 %355 }
 0x181   :  { %v566_v63 = vsel %vm4237_vm3, %v556_v32, %v558_v34  ;;  %v567_v0 = vsel %vm4237_vm3, %v558_v34, %v3234_v29  ;;  %v363_v2 = vsel %vm4231_vm2, %v354_v40, %v356_v61  ;;  %v364_v7 = vsel %vm4231_vm2, %v356_v61, %v358_v41 }
 0x182   :  { %574 = vst [vmem:[#allocation3 + $0x58] sm:$0xf] %v566_v63  ;;  %575 = vst [vmem:[#allocation3 + $0x10] sm:$0xf] %v567_v0  ;;  %vm4232_vm2 = vcmask 1031168  }
 0x183   :  { %371 = vst [vmem:[#allocation3 + $0x68] sm:$0xf0] %v363_v2  ;;  %372 = vst [vmem:[#allocation3 + $0x78] sm:$0xf0] %v364_v7 }
 0x184   :  { %v421_v9 = vpop.permute.xlu1 %420  ;;  %v219_v10 = vpop.permute.xlu0 %218 }
 0x185   :  { %v429_v19 = vsel %vm4234_vm4, %v3240_v37, %v421_v9  ;;  %v430_v11 = vsel %vm4234_vm4, %v421_v9, %v3236_v31  ;;  %v226_v13 = vsel %vm4233_vm5, %v3245_v44, %v219_v10 }
 0x186   :  { %437 = vst [vmem:[#allocation3 + $0x8] sm:$0xf] %v429_v19  ;;  %438 = vst [vmem:[#allocation3 + $0x88] sm:$0xf] %v430_v11 }
 0x187   :  { %234 = vst [vmem:[#allocation3 + $0x38] sm:$0xf0] %v226_v13 }
 0x188   :  { %v285_v14 = vpop.permute.xlu1 %284  ;;  %v289_v15 = vpop.permute.xlu0 %288 }
 0x189   :  { %v293_v16 = vsel %vm4232_vm2, %v3242_v42, %v285_v14  ;;  %v294_v17 = vsel %vm4232_vm2, %v285_v14, %v3238_v33  ;;  %v295_v18 = vsel %vm4232_vm2, %v3238_v33, %v289_v15  ;;  %v296_v25 = vsel %vm4232_vm2, %v289_v15, %v3232_v27  ;;  %v729_v30 = vld [vmem:[#allocation3 + $0x10] sm:$0xff]  ;;  %v728_v32 = vld [vmem:[#allocation3 + $0x58] sm:$0xff] }
 0x18a   :  { %301 = vst [vmem:[#allocation3 + $0x30] sm:$0xf] %v293_v16  ;;  %302 = vst [vmem:[#allocation3 + $0x68] sm:$0xf] %v294_v17  ;;  %782 = vmatprep.subr.mxu0 %v729_v30  ;;  %vm742_vm2 = vcmask 293888  }
 0x18b   :  { %303 = vst [vmem:[#allocation3 + $0x78] sm:$0xf] %v295_v18  ;;  %304 = vst [vmem:[#allocation3 + $0x80] sm:$0xf] %v296_v25  ;;  %783 = vmatpush1.msra.mxu0 %v728_v32 }
 0x18c   :  { %v215_v35 = vpop.permute.xlu1 %214  ;;  %v221_v36 = vpop.permute.xlu0 %220 }
 0x18d   :  { %v225_v37 = vsel %vm4233_vm5, %v215_v35, %v3245_v44  ;;  %v227_v38 = vsel %vm4233_vm5, %v219_v10, %v221_v36  ;;  %v725_v40 = vld [vmem:[#allocation3 + $0x88] sm:$0xff] }
 0x18e   :  { %v724_v33 = vld [vmem:[#allocation3 + $0x8] sm:$0xff]  ;;  %233 = vst [vmem:[#allocation3] sm:$0xf0] %v225_v37  ;;  %235 = vst [vmem:[#allocation3 + $0x50] sm:$0xf0] %v227_v38  ;;  %784 = vmatprep.subr.mxu0 %v725_v40  ;;  %v717_v44 = vld [vmem:[#allocation3 + $0x38] sm:$0xff] }
 0x18f   :  { %785 = vmatpush1.msra.mxu0 %v724_v33  ;;  %v921_v37 = vld [vmem:[%s4221_s3] sm:$0xff] }
 0x190   :  { %v699_v27 = vpop.permute.xlu1 %698  ;;  %v2540_v40 = vld [vmem:[%s4227_s9 + $0x20] ss:$8 sm:$0xf] }
 0x191   :  { %v705_v41 = vsel %vm4235_vm14, %v3248_v49, %v699_v27  ;;  %v706_v42 = vsel %vm4235_vm14, %v699_v27, %v3226_v62  ;;  %v721_v43 = vld [vmem:[#allocation3 + $0x68] sm:$0xff]  ;;  %v720_v39 = vld [vmem:[#allocation3 + $0x30] sm:$0xff] }
 0x192   :  { %713 = vst [vmem:[#allocation3 + $0x70] sm:$0xf] %v705_v41  ;;  %714 = vst [vmem:[#allocation3 + $0x90] sm:$0xf] %v706_v42  ;;  %786 = vmatprep.subr.mxu0 %v721_v43  ;;  %v722_v52 = vld [vmem:[#allocation3 + $0x78] sm:$0xff]  ;;  %v925_v27 = vld [vmem:[%s4222_s4] sm:$0xff]  ;;  %v1532_v42 = vrot.slane %v2540_v40, %v2971_v4 }
 0x193   :  { %787 = vmatpush1.msra.mxu0 %v720_v39  ;;  %v2539_v43 = vld [vmem:[%s4227_s9 + $0x7] ss:$8 sm:$0xf] }
 0x194   :  { %v562_v46 = vpop.permute.xlu1 %561  ;;  %788 = vmatprep.subr.mxu0 %v717_v44  ;;  %v1457_v44 = vrot.slane %v2539_v43, %v2969_v3 }
 0x195   :  { %v568_v50 = vsel %vm4237_vm3, %v3234_v29, %v562_v46  ;;  %v569_v49 = vsel %vm4237_vm3, %v562_v46, %v3228_v23  ;;  %v716_v51 = vld [vmem:[#allocation3] sm:$0xff]  ;;  %v718_v54 = vld [vmem:[#allocation3 + $0x50] sm:$0xff]  ;;  %v1528_v46 = vrot.slane %v2540_v40, %v2969_v3 }
 0x196   :  { %576 = vst [vmem:[#allocation3 + $0x98] sm:$0xf] %v568_v50  ;;  %577 = vst [vmem:[#allocation3 + $0x60] sm:$0xf] %v569_v49  ;;  %789 = vmatpush1.msra.mxu0 %v716_v51  ;;  %v1536_v50 = vrot.slane %v2540_v40, %v2973_v5 }
 0x197   :  { %2529 = vmatmul.mubr.msk.f32.vlgmr.msra.gmra.mxu0 %vm742_vm2, %v715_v47  ;;  %v2538_v49 = vld [vmem:[%s4227_s9 + $0x6] ss:$8 sm:$0xf] }
 0x198   :  { %v425_v62 = vpop.permute.xlu1 %424  ;;  %1700 = vmatprep.mubr.f32.mxu0 %v2863_v1  ;;  %v1390_v51 = vrot.slane %v2538_v49, %v2971_v4 }
 0x199   :  { %v431_v48 = vsel %vm4234_vm4, %v3236_v31, %v425_v62  ;;  %v432_v12 = vsel %vm4234_vm4, %v425_v62, %v3230_v8  ;;  %v735_v28 = vld [vmem:[#allocation3 + $0x90] sm:$0xf]  ;;  %v723_v8 = vld [vmem:[#allocation3 + $0x80] sm:$0xff]  ;;  %v740_v56 = vpop.permute.xlu0 %739  ;;  %v1461_v62 = vrot.slane %v2539_v43, %v2971_v4 }
 0x19a   :  { %v734_v29 = vld [vmem:[#allocation3 + $0x70] sm:$0xf]  ;;  %439 = vst [vmem:[#allocation3 + $0x28] sm:$0xf] %v431_v48  ;;  %440 = vst [vmem:[#allocation3 + $0x40] sm:$0xf] %v432_v12  ;;  %2530 = vmatprep.subr.msk.mxu1 %vm120_vm6, %v735_v28  ;;  %v1540_v48 = vrot.slane %v2540_v40, %v2975_v6  ;;  %v1386_v12 = vrot.slane %v2538_v49, %v2969_v3 }
 0x19b   :  { %2531 = vmatpush1.msk.msra.mxu1 %vm120_vm6, %v734_v29  ;;  %v2537_v28 = vld [vmem:[%s4227_s9 + $0x5] ss:$8 sm:$0xf] }
 0x19c   :  { %v223_v23 = vpop.permute.xlu1 %222  ;;  %v1319_v29 = vrot.slane %v2537_v28, %v2971_v4 }
 0x19d   :  { %v228_v45 = vsel %vm4233_vm5, %v221_v36, %v223_v23  ;;  %v731_v24 = vld [vmem:[#allocation3 + $0x60] sm:$0xff]  ;;  %v730_v20 = vld [vmem:[#allocation3 + $0x98] sm:$0xff]  ;;  %v1394_v23 = vrot.slane %v2538_v49, %v2973_v5  ;;  %vm959_vm5 = vcmask 277640  }
 0x19e   :  { %236 = vst [vmem:[#allocation3 + $0x18] sm:$0xf0] %v228_v45  ;;  %853 = vmatprep.subr.mxu1 %v731_v24  ;;  %v1469_v45 = vrot.slane %v2539_v43, %v2975_v6  ;;  %v1315_v24 = vrot.slane %v2537_v28, %v2969_v3  ;;  %960 = vst.msk [vmem:[#allocation4 + $0x20] sm:$0xff] %vm959_vm5, %v2863_v1 }
 0x19f   :  { %854 = vmatpush1.msra.mxu1 %v730_v20  ;;  %v2536_v20 = vld [vmem:[%s4227_s9 + $0x4] ss:$8 sm:$0xf] }
 0x1a1   :  { %v727_v31 = vld [vmem:[#allocation3 + $0x40] sm:$0xff]  ;;  %v726_v26 = vld [vmem:[#allocation3 + $0x28] sm:$0xff] }
 0x1a2   :  { %855 = vmatprep.subr.mxu1 %v727_v31  ;;  %v1323_v31 = vrot.slane %v2537_v28, %v2973_v5 }
 0x1a3   :  { %856 = vmatpush1.msra.mxu1 %v726_v26  ;;  %v1248_v26 = vrot.slane %v2536_v20, %v2971_v4 }
 0x1a4   :  { %857 = vmatprep.subr.mxu1 %v723_v8  ;;  %v1244_v8 = vrot.slane %v2536_v20, %v2969_v3 }
 0x1a5   :  { %858 = vmatpush1.msra.mxu1 %v722_v52  ;;  %v719_v53 = vld [vmem:[#allocation3 + $0x18] sm:$0xff]  ;;  %v1398_v52 = vrot.slane %v2538_v49, %v2975_v6 }
 0x1a6   :  { %859 = vmatprep.subr.mxu1 %v719_v53  ;;  %v2535_v53 = vld [vmem:[%s4227_s9 + $0x3] ss:$8 sm:$0xf] }
 0x1a7   :  { %860 = vmatpush1.msra.mxu1 %v718_v54  ;;  %v1252_v54 = vrot.slane %v2536_v20, %v2973_v5  ;;  %v1185_v40 = vrot.slane %v2535_v53, %v2975_v6 }
 0x1a8   :  { %2532 = vmatmul.mubr.msk.f32.vlgmr.msra.gmra.mxu1 %vm742_vm2, %v715_v47  ;;  %v1465_v47 = vrot.slane %v2539_v43, %v2973_v5 }
 0x1a9   :  { %1771 = vmatprep.mubr.f32.mxu1 %v2863_v1 }
 0x257   :  { %v824_v55 = vpop.f32.mrf.mxu0 }
 0x258   :  { %v3304_v57 = vadd.f32 %v824_v55, %v740_v56  ;;  %v1177_v55 = vrot.slane %v2535_v53, %v2971_v4 }
 0x259   :  { %v826_v21 = vpop.f32.mrf.mxu0 }
 0x25a   :  { %v3306_v58 = vadd.f32 %v826_v21, %v740_v56  ;;  %v1173_v21 = vrot.slane %v2535_v53, %v2969_v3 }
 0x25c   :  { %v900_v34 = vadd.f32 %v3306_v58, %v3304_v57 }
 0x268   :  { %v895_v59 = vpop.f32.mrf.mxu1 }
 0x269   :  { %v3308_v60 = vadd.f32 %v895_v59, %v740_v56  ;;  %v2534_v59 = vld [vmem:[%s4227_s9 + $0x2] ss:$8 sm:$0xf] }
 0x26a   :  { %v897_v61 = vpop.f32.mrf.mxu1 }
 0x26b   :  { %v3312_v63 = vadd.f32 %v897_v61, %v740_v56  ;;  %v901_v0 = vadd.f32 %v900_v34, %v3308_v60  ;;  %v1327_v56 = vrot.slane %v2537_v28, %v2975_v6  ;;  %v1181_v34 = vrot.slane %v2535_v53, %v2973_v5 }
 0x26c   :  { %v1106_v61 = vrot.slane %v2534_v59, %v2971_v4 }
 0x26d   :  { %v902_v2 = vadd.f32 %v901_v0, %v3312_v63  ;;  %v1102_v0 = vrot.slane %v2534_v59, %v2969_v3 }
 0x26f   :  { %903 = vadd.xlane.f32.xlu1 %v902_v2  ;;  %v1256_v2 = vrot.slane %v2536_v20, %v2975_v6 }
 0x2f8   :  { %v904_v7 = vpop.xlane.xlu1 %903 }
 0x2f9   :  { %v906_v9 = vmul.f32 0.001953125, %v904_v7  ;;  %v2533_v7 = vld [vmem:[%s4227_s9 + $0x1] ss:$8 sm:$0xf] }
 0x2fa   :  { %v1043_v1 = vrot.slane %v2533_v7, %v2975_v6 }
 0x2fb   :  { %v907_v10 = vsub.f32 %v3304_v57, %v906_v9  ;;  %v908_v19 = vsub.f32 %v3306_v58, %v906_v9  ;;  %v909_v11 = vsub.f32 %v3308_v60, %v906_v9  ;;  %v910_v13 = vsub.f32 %v3312_v63, %v906_v9 }
 0x2fd   :  { %v911_v14 = vmul.f32 %v907_v10, %v907_v10  ;;  %v912_v15 = vmul.f32 %v908_v19, %v908_v19  ;;  %v913_v16 = vmul.f32 %v909_v11, %v909_v11  ;;  %v914_v18 = vmul.f32 %v910_v13, %v910_v13 }
 0x2fe   :  { %v1035_v10 = vrot.slane %v2533_v7, %v2971_v4  ;;  %v1031_v19 = vrot.slane %v2533_v7, %v2969_v3 }
 0x2ff   :  { %v915_v17 = vadd.f32 %v912_v15, %v911_v14 }
 0x301   :  { %v916_v25 = vadd.f32 %v915_v17, %v913_v16 }
 0x303   :  { %v917_v30 = vadd.f32 %v916_v25, %v914_v18 }
 0x305   :  { %918 = vadd.xlane.f32.xlu0 %v917_v30 }
 0x38e   :  { %v919_v32 = vpop.xlane.xlu0 %918 }
 0x38f   :  { %v920_v35 = vmul.f32 0.001953125, %v919_v32 }
 0x391   :  { %v922_v36 = vadd.f32 1e-05, %v920_v35 }
 0x393   :  { %2722 = vrsqrt.f32 %v922_v36 }
 0x3a0   :  { %v2723_v38 = vpop.eup %2722 }
 0x3a1   :  { %v924_v33 = vmul.f32 %v2723_v38, %v921_v37 }
 0x3a3   :  { %930 = vperm.xlu1 %2641, %v924_v33   ;;  %v926_v41 = vmul.f32 %v924_v33, %v906_v9  ;;  %v1110_v9 = vrot.slane %v2534_v59, %v2973_v5  ;;  %v1114_v33 = vrot.slane %v2534_v59, %v2975_v6 }
 0x3a5   :  { %v927_v39 = vsub.f32 %v925_v27, %v926_v41 }
 0x3a7   :  { %939 = vperm.xlu0 %2640, %v927_v39   ;;  %1543 = vrot.lane.b32.xlu1 %v1532_v42, %s2865_s17 }
 0x3ab   :  { %1470 = vrot.lane.b32.xlu1 %v1457_v44, %s2866_s19  ;;  %1541 = vrot.lane.b32.xlu0 %v1528_v46, %s2865_s17 }
 0x3af   :  { %1474 = vrot.lane.b32.xlu1 %v1465_v47, %s2866_s19  ;;  %1545 = vrot.lane.b32.xlu0 %v1536_v50, %s2865_s17 }
 0x3b3   :  { %1401 = vrot.lane.b32.xlu1 %v1390_v51, %s2857_s30  ;;  %1472 = vrot.lane.b32.xlu0 %v1461_v62, %s2866_s19 }
 0x3b7   :  { %1547 = vrot.lane.b32.xlu1 %v1540_v48, %s2865_s17  ;;  %1399 = vrot.lane.b32.xlu0 %v1386_v12, %s2857_s30 }
 0x3bb   :  { %1330 = vrot.lane.b32.xlu1 %v1319_v29, %s2867_s23  ;;  %1403 = vrot.lane.b32.xlu0 %v1394_v23, %s2857_s30 }
 0x3bf   :  { %1476 = vrot.lane.b32.xlu1 %v1469_v45, %s2866_s19  ;;  %1328 = vrot.lane.b32.xlu0 %v1315_v24, %s2867_s23 }
 0x3c3   :  { %1332 = vrot.lane.b32.xlu0 %v1323_v31, %s2867_s23  ;;  %1259 = vrot.lane.b32.xlu1 %v1248_v26, %s2864_s29 }
 0x3c7   :  { %1257 = vrot.lane.b32.xlu0 %v1244_v8, %s2864_s29  ;;  %1405 = vrot.lane.b32.xlu1 %v1398_v52, %s2857_s30 }
 0x3cb   :  { %1261 = vrot.lane.b32.xlu0 %v1252_v54, %s2864_s29  ;;  %1188 = vrot.lane.b32.xlu1 %v1177_v55, %s2868_s27 }
 0x3cf   :  { %1186 = vrot.lane.b32.xlu0 %v1173_v21, %s2868_s27  ;;  %1334 = vrot.lane.b32.xlu1 %v1327_v56, %s2867_s23 }
 0x3d3   :  { %1190 = vrot.lane.b32.xlu0 %v1181_v34, %s2868_s27  ;;  %1117 = vrot.lane.b32.xlu1 %v1106_v61, %s2869_s28 }
 0x3d7   :  { %1115 = vrot.lane.b32.xlu0 %v1102_v0, %s2869_s28  ;;  %1263 = vrot.lane.b32.xlu1 %v1256_v2, %s2864_s29 }
 0x3db   :  { %1119 = vrot.lane.b32.xlu0 %v1110_v9, %s2869_s28  ;;  %1046 = vrot.lane.b32.xlu1 %v1035_v10, %s2870_s5 }
 0x3df   :  { %1044 = vrot.lane.b32.xlu0 %v1031_v19, %s2870_s5 }
 0x41e   :  { %v931_v11 = vpop.permute.xlu1 %930 }
 0x41f   :  { %v935_v13 = vmul.f32 %v931_v11, %v3308_v60  ;;  %v933_v14 = vmul.f32 %v931_v11, %v3304_v57  ;;  %v934_v15 = vmul.f32 %v931_v11, %v3306_v58  ;;  %v1039_v57 = vrot.slane %v2533_v7, %v2973_v5 }
 0x420   :  { %v936_v58 = vmul.f32 %v931_v11, %v3312_v63 }
 0x422   :  { %v940_v16 = vpop.permute.xlu0 %939  ;;  %v3423_v63 = vpop.permute.xlu1 %1543 }
 0x423   :  { %v944_v17 = vadd.f32 %v940_v16, %v935_v13  ;;  %v942_v18 = vadd.f32 %v940_v16, %v933_v14  ;;  %v943_v25 = vadd.f32 %v940_v16, %v934_v15  ;;  %v945_v38 = vadd.f32 %v940_v16, %v936_v58 }
 0x425   :  { %vm948_vm6 = vcmp.gt.f32.partialorder %v944_v17, 0.0  ;;  %v952_v30 = vmul.f32 0.2, %v944_v17  ;;  %vm946_vm2 = vcmp.gt.f32.partialorder %v942_v18, 0.0  ;;  %v950_v32 = vmul.f32 0.2, %v942_v18 }
 0x426   :  { %v951_v37 = vmul.f32 0.2, %v943_v25  ;;  %vm947_vm4 = vcmp.gt.f32.partialorder %v943_v25, 0.0  ;;  %v953_v27 = vmul.f32 0.2, %v945_v38  ;;  %v3425_v42 = vpop.permute.xlu1 %1470  ;;  %v1542_v46 = vpop.permute.xlu0 %1541 }
 0x427   :  { %v956_v35 = vsel %vm948_vm6, %v944_v17, %v952_v30  ;;  %v954_v36 = vsel %vm946_vm2, %v942_v18, %v950_v32  ;;  %vm949_vm6 = vcmp.gt.f32.partialorder %v945_v38, 0.0  ;;  %vm4247_vm2 = vcmask 1039360  }
 0x428   :  { %969 = vrot.lane.b32.xlu0 %v956_v35, %s2864_s29  ;;  %965 = vrot.lane.b32.xlu1 %v954_v36, %s2864_s29  ;;  %v955_v60 = vsel %vm947_vm4, %v943_v25, %v951_v37  ;;  %v957_v41 = vsel %vm949_vm6, %v945_v38, %v953_v27  ;;  %vm981_vm4 = vcmask 1047688   ;;  %vm4248_vm6 = vmmov %vm4247_vm2 }
 0x42a   :  { %v3427_v43 = vpop.permute.xlu1 %1474  ;;  %v3435_v50 = vpop.permute.xlu0 %1545 }
 0x42c   :  { %1048 = vrot.lane.b32.xlu0 %v1039_v57, %s2870_s5  ;;  %967 = vrot.lane.b32.xlu1 %v955_v60, %s2864_s29  ;;  %v1549_v57 = vsel %vm677_vm7, %v1542_v46, %v3423_v63 }
 0x42e   :  { %v3429_v39 = vpop.permute.xlu1 %1401  ;;  %v3441_v62 = vpop.permute.xlu0 %1472 }
 0x430   :  { %1192 = vrot.lane.b32.xlu1 %v1185_v40, %s2868_s27  ;;  %1121 = vrot.lane.b32.xlu0 %v1114_v33, %s2869_s28  ;;  %v1479_v33 = vsel %vm608_vm9, %v3441_v62, %v3427_v43 }
 0x432   :  { %v3431_v44 = vpop.permute.xlu1 %1547  ;;  %v3445_v12 = vpop.permute.xlu0 %1399 }
 0x434   :  { %971 = vrot.lane.b32.xlu1 %v957_v41, %s2864_s29 }
 0x436   :  { %v3433_v47 = vpop.permute.xlu1 %1330  ;;  %v3449_v29 = vpop.permute.xlu0 %1403 }
 0x438   :  { %1050 = vrot.lane.b32.xlu1 %v1043_v1, %s2870_s5 }
 0x43a   :  { %v3437_v49 = vpop.permute.xlu1 %1476  ;;  %v3453_v45 = vpop.permute.xlu0 %1328 }
 0x43e   :  { %v3439_v51 = vpop.permute.xlu1 %1259  ;;  %v3457_v20 = vpop.permute.xlu0 %1332 }
 0x442   :  { %v3443_v48 = vpop.permute.xlu1 %1405  ;;  %v3461_v26 = vpop.permute.xlu0 %1257 }
 0x446   :  { %v3447_v28 = vpop.permute.xlu1 %1188  ;;  %v3465_v52 = vpop.permute.xlu0 %1261 }
 0x44a   :  { %v3451_v23 = vpop.permute.xlu1 %1334  ;;  %v3468_v54 = vpop.permute.xlu0 %1186 }
 0x44e   :  { %v3455_v24 = vpop.permute.xlu1 %1117  ;;  %v3470_v21 = vpop.permute.xlu0 %1190 }
 0x452   :  { %v3459_v31 = vpop.permute.xlu1 %1263  ;;  %v3487_v9 = vpop.permute.xlu0 %1115 }
 0x456   :  { %v3463_v8 = vpop.permute.xlu1 %1046  ;;  %v3497_v13 = vpop.permute.xlu0 %1119 }
 0x45a   :  { %v3505_v16 = vpop.permute.xlu0 %1044 }
 0x49a   :  { %v966_v53 = vpop.permute.xlu1 %965  ;;  %v970_v32 = vpop.permute.xlu0 %969 }
 0x49b   :  { %982 = vst.msk [vmem:[#allocation4] sm:$0xff] %vm981_vm4, %v966_v53 }
 0x49e   :  { %v968_v55 = vpop.permute.xlu1 %967  ;;  %v3529_v58 = vpop.permute.xlu0 %1048 }
 0x49f   :  { %v3523_v37 = vsel %vm118_vm1, %v966_v53, %v968_v55  ;;  %v3535_v40 = vsel %vm118_vm1, %v968_v55, %v970_v32  ;;  %v1407_v53 = vsel %vm540_vm8, %v3445_v12, %v3429_v39 }
 0x4a0   :  { %v1558_v60 = vmul.f32 %v1549_v57, %v3523_v37  ;;  %v1488_v1 = vmul.f32 %v1479_v33, %v3535_v40  ;;  %v1416_v55 = vmul.f32 %v1407_v53, %v3523_v37 }
 0x4a2   :  { %v1193_v56 = vpop.permute.xlu1 %1192  ;;  %v3472_v59 = vld [vmem:[#allocation4] sm:$0xff]  ;;  %v1122_v27 = vpop.permute.xlu0 %1121 }
 0x4a3   :  { %v3476_v34 = vsel %vm335_vm12, %v3470_v21, %v1193_v56  ;;  %v1486_v61 = vmul.f32 %v3425_v42, %v3472_v59  ;;  %v1557_v0 = vmul.f32 %v1542_v46, %v3472_v59  ;;  %v1415_v7 = vmul.f32 %v3472_v59, %v3445_v12 }
 0x4a4   :  { %v1344_v14 = vmul.f32 %v3472_v59, %v3453_v45  ;;  %v1273_v15 = vmul.f32 %v3472_v59, %v3461_v26  ;;  %v1202_v25 = vmul.f32 %v3472_v59, %v3468_v54  ;;  %v1131_v30 = vmul.f32 %v3472_v59, %v3487_v9 }
 0x4a5   :  { %1496 = vrot.lane.b32.xlu1 %v1486_v61, %s2875_s1  ;;  %1567 = vrot.lane.b32.xlu0 %v1557_v0, %s2871_s14  ;;  %v1060_v38 = vmul.f32 %v3472_v59, %v3505_v16  ;;  %v1550_v46 = vsel %vm677_vm7, %v3423_v63, %v3435_v50  ;;  %v1551_v0 = vsel %vm677_vm7, %v3435_v50, %v3431_v44  ;;  %vm4239_vm7 = vcmask 908288  }
 0x4a6   :  { %v972_v2 = vpop.permute.xlu1 %971  ;;  %v1478_v63 = vsel %vm608_vm9, %v3425_v42, %v3441_v62  ;;  %v1336_v62 = vsel %vm471_vm11, %v3453_v45, %v3433_v47 }
 0x4a7   :  { %986 = vst.msk [vmem:[#allocation4 + $0x20] sm:$0xff] %vm118_vm1, %v972_v2  ;;  %v3555_v61 = vsel %vm118_vm1, %v970_v32, %v972_v2  ;;  %v1408_v2 = vsel %vm540_vm8, %v3429_v39, %v3449_v29  ;;  %v1265_v39 = vsel %vm118_vm1, %v3461_v26, %v3439_v51  ;;  %v1052_v32 = vsel %vm198_vm13, %v3505_v16, %v3463_v8 }
 0x4a8   :  { %v1560_v12 = vmul.f32 %v1551_v0, %v3555_v61  ;;  %v1417_v42 = vmul.f32 %v1408_v2, %v3535_v40  ;;  %v1205_v57 = vmul.f32 %v3476_v34, %v3555_v61 }
 0x4a9   :  { %1425 = vrot.lane.b32.xlu0 %v1415_v7, %s2872_s15  ;;  %v1487_v7 = vmul.f32 %v1478_v63, %v3523_v37 }
 0x4ae   :  { %v3489_v10 = vld [vmem:[#allocation4 + $0x20] sm:$0xff] }
 0x4af   :  { %v1561_v19 = vmul.f32 %v3431_v44, %v3489_v10  ;;  %v1490_v11 = vmul.f32 %v3437_v49, %v3489_v10  ;;  %v1419_v17 = vmul.f32 %v3443_v48, %v3489_v10  ;;  %v1348_v18 = vmul.f32 %v3451_v23, %v3489_v10 }
 0x4b0   :  { %v1277_v35 = vmul.f32 %v3459_v31, %v3489_v10  ;;  %v1206_v36 = vmul.f32 %v1193_v56, %v3489_v10  ;;  %v1135_v41 = vmul.f32 %v1122_v27, %v3489_v10  ;;  %v1559_v56 = vmul.f32 %v1550_v46, %v3535_v40 }
 0x4b1   :  { %1575 = vrot.lane.b32.xlu1 %v1561_v19, %s2871_s14  ;;  %1504 = vrot.lane.b32.xlu0 %v1490_v11, %s2875_s1  ;;  %v1337_v44 = vsel %vm471_vm11, %v3433_v47, %v3457_v20  ;;  %v1274_v19 = vmul.f32 %v1265_v39, %v3523_v37  ;;  %v1345_v11 = vmul.f32 %v1336_v62, %v3523_v37 }
 0x4b2   :  { %v1346_v50 = vmul.f32 %v1337_v44, %v3535_v40  ;;  %v1409_v47 = vsel %vm540_vm8, %v3449_v29, %v3443_v48  ;;  %v1194_v29 = vsel %vm335_vm12, %v3468_v54, %v3447_v28  ;;  %vm4240_vm8 = vmmov %vm4239_vm7 }
 0x4b3   :  { %v1418_v45 = vmul.f32 %v1409_v47, %v3555_v61 }
 0x4b5   :  { %1354 = vrot.lane.b32.xlu1 %v1344_v14, %s2876_s20  ;;  %1283 = vrot.lane.b32.xlu0 %v1273_v15, %s2873_s16  ;;  %v1480_v14 = vsel %vm608_vm9, %v3427_v43, %v3437_v49  ;;  %v1266_v15 = vsel %vm118_vm1, %v3439_v51, %v3465_v52  ;;  %v1195_v43 = vsel %vm335_vm12, %v3447_v28, %v3470_v21  ;;  %vm4241_vm9 = vcmask 916480   ;;  %vm4244_vm12 = vmmov %vm4239_vm7 }
 0x4b6   :  { %v1489_v26 = vmul.f32 %v1480_v14, %v3555_v61  ;;  %v1204_v49 = vmul.f32 %v1195_v43, %v3535_v40  ;;  %v1275_v48 = vmul.f32 %v1266_v15, %v3535_v40  ;;  %v1123_v51 = vsel %vm267_vm10, %v3487_v9, %v3455_v24 }
 0x4b7   :  { %v1203_v21 = vmul.f32 %v1194_v29, %v3523_v37  ;;  %v1267_v28 = vsel %vm118_vm1, %v3465_v52, %v3459_v31  ;;  %v1125_v52 = vsel %vm267_vm10, %v3497_v13, %v1122_v27 }
 0x4b8   :  { %v1276_v54 = vmul.f32 %v1267_v28, %v3555_v61 }
 0x4b9   :  { %1433 = vrot.lane.b32.xlu1 %v1419_v17, %s2872_s15  ;;  %1362 = vrot.lane.b32.xlu0 %v1348_v18, %s2876_s20  ;;  %v1132_v17 = vmul.f32 %v1123_v51, %v3523_v37  ;;  %v1338_v18 = vsel %vm471_vm11, %v3457_v20, %v3451_v23  ;;  %v1124_v23 = vsel %vm267_vm10, %v3455_v24, %v3497_v13  ;;  %vm4242_vm10 = vmmov %vm4241_vm9 }
 0x4ba   :  { %v1347_v9 = vmul.f32 %v1338_v18, %v3555_v61  ;;  %v1133_v31 = vmul.f32 %v1124_v23, %v3535_v40  ;;  %v1061_v24 = vmul.f32 %v1052_v32, %v3523_v37  ;;  %vm4243_vm11 = vmmov %vm4239_vm7 }
 0x4bd   :  { %1212 = vrot.lane.b32.xlu1 %v1202_v25, %s2877_s21  ;;  %1141 = vrot.lane.b32.xlu0 %v1131_v30, %s2874_s18  ;;  %v1053_v25 = vsel %vm198_vm13, %v3463_v8, %v3529_v58  ;;  %v1051_v30 = vpop.permute.xlu1 %1050  ;;  %v1626_v8 = vld [vmem:[%s4224_s6] sm:$0xff] }
 0x4be   :  { %v1062_v20 = vmul.f32 %v1053_v25, %v3535_v40  ;;  %v1064_v16 = vmul.f32 %v1051_v30, %v3489_v10 }
 0x4c1   :  { %1291 = vrot.lane.b32.xlu1 %v1277_v35, %s2873_s16  ;;  %1220 = vrot.lane.b32.xlu0 %v1206_v36, %s2877_s21  ;;  %v1134_v35 = vmul.f32 %v1125_v52, %v3555_v61  ;;  %v1054_v36 = vsel %vm198_vm13, %v3529_v58, %v1051_v30  ;;  %vm4245_vm13 = vcmask 1031168  }
 0x4c2   :  { %v1063_v13 = vmul.f32 %v1054_v36, %v3555_v61  ;;  %vm4246_vm5 = vmmov %vm4245_vm13 }
 0x4c5   :  { %1569 = vrot.lane.b32.xlu0 %v1558_v60, %s2871_s14  ;;  %1070 = vrot.lane.b32.xlu1 %v1060_v38, %s2878_s10 }
 0x4c9   :  { %1500 = vrot.lane.b32.xlu0 %v1488_v1, %s2875_s1  ;;  %1149 = vrot.lane.b32.xlu1 %v1135_v41, %s2874_s18 }
 0x4cd   :  { %1427 = vrot.lane.b32.xlu0 %v1416_v55, %s2872_s15  ;;  %1571 = vrot.lane.b32.xlu1 %v1559_v56, %s2871_s14 }
 0x4d1   :  { %1573 = vrot.lane.b32.xlu0 %v1560_v12, %s2871_s14  ;;  %1498 = vrot.lane.b32.xlu1 %v1487_v7, %s2875_s1 }
 0x4d5   :  { %1358 = vrot.lane.b32.xlu0 %v1346_v50, %s2876_s20  ;;  %1429 = vrot.lane.b32.xlu1 %v1417_v42, %s2872_s15 }
 0x4d9   :  { %1285 = vrot.lane.b32.xlu0 %v1274_v19, %s2873_s16  ;;  %1356 = vrot.lane.b32.xlu1 %v1345_v11, %s2876_s20 }
 0x4dd   :  { %1431 = vrot.lane.b32.xlu0 %v1418_v45, %s2872_s15  ;;  %1502 = vrot.lane.b32.xlu1 %v1489_v26, %s2875_s1 }
 0x4e1   :  { %1216 = vrot.lane.b32.xlu0 %v1204_v49, %s2877_s21  ;;  %1287 = vrot.lane.b32.xlu1 %v1275_v48, %s2873_s16 }
 0x4e5   :  { %1143 = vrot.lane.b32.xlu0 %v1132_v17, %s2874_s18  ;;  %1214 = vrot.lane.b32.xlu1 %v1203_v21, %s2877_s21 }
 0x4e9   :  { %1289 = vrot.lane.b32.xlu0 %v1276_v54, %s2873_s16  ;;  %1360 = vrot.lane.b32.xlu1 %v1347_v9, %s2876_s20 }
 0x4ed   :  { %1074 = vrot.lane.b32.xlu0 %v1062_v20, %s2878_s10  ;;  %1145 = vrot.lane.b32.xlu1 %v1133_v31, %s2874_s18 }
 0x4f1   :  { %1072 = vrot.lane.b32.xlu1 %v1061_v24, %s2878_s10  ;;  %1147 = vrot.lane.b32.xlu0 %v1134_v35, %s2874_s18 }
 0x4f5   :  { %1218 = vrot.lane.b32.xlu1 %v1205_v57, %s2877_s21  ;;  %1076 = vrot.lane.b32.xlu0 %v1063_v13, %s2878_s10 }
 0x4f9   :  { %1078 = vrot.lane.b32.xlu1 %v1064_v16, %s2878_s10  ;;  %1629 = vperm.xlu0 %2640, %v1626_v8   ;;  %v991_v16 = vld [vmem:[%s4227_s9] ss:$8 sm:$0xf] }
 0x517   :  { %v1568_v58 = vpop.permute.xlu0 %1567  ;;  %v1497_v60 = vpop.permute.xlu1 %1496 }
 0x51b   :  { %v1426_v38 = vpop.permute.xlu0 %1425 }
 0x523   :  { %v1576_v33 = vpop.permute.xlu1 %1575  ;;  %v1505_v27 = vpop.permute.xlu0 %1504 }
 0x527   :  { %v1355_v41 = vpop.permute.xlu1 %1354  ;;  %v1284_v34 = vpop.permute.xlu0 %1283 }
 0x52b   :  { %v1434_v1 = vpop.permute.xlu1 %1433  ;;  %v3660_v46 = vpop.permute.xlu0 %1362 }
 0x52f   :  { %v1213_v53 = vpop.permute.xlu1 %1212  ;;  %v3662_v55 = vpop.permute.xlu0 %1141 }
 0x533   :  { %v3664_v56 = vpop.permute.xlu1 %1291  ;;  %v3666_v0 = vpop.permute.xlu0 %1220 }
 0x537   :  { %v3668_v10 = vpop.permute.xlu1 %1070  ;;  %v1570_v63 = vpop.permute.xlu0 %1569 }
 0x538   :  { %v1577_v42 = vsel %vm4235_vm14, %v1568_v58, %v1570_v63 }
 0x53b   :  { %v3670_v12 = vpop.permute.xlu1 %1149  ;;  %v1501_v7 = vpop.permute.xlu0 %1500 }
 0x53f   :  { %v1572_v2 = vpop.permute.xlu1 %1571  ;;  %v1428_v44 = vpop.permute.xlu0 %1427 }
 0x540   :  { %v1578_v50 = vsel %vm4235_vm14, %v1570_v63, %v1572_v2  ;;  %v1435_v43 = vsel %vm4237_vm3, %v1426_v38, %v1428_v44 }
 0x541   :  { %1650 = vmatprep.subr.mxu0 %v1578_v50 }
 0x542   :  { %1651 = vmatpush1.msra.mxu0 %v1577_v42 }
 0x543   :  { %v1499_v62 = vpop.permute.xlu1 %1498  ;;  %v1574_v39 = vpop.permute.xlu0 %1573 }
 0x544   :  { %v1506_v19 = vsel %vm4236_vm15, %v1497_v60, %v1499_v62  ;;  %v1579_v11 = vsel %vm4235_vm14, %v1572_v2, %v1574_v39  ;;  %v1507_v14 = vsel %vm4236_vm15, %v1499_v62, %v1501_v7  ;;  %v1580_v47 = vsel %vm4235_vm14, %v1574_v39, %v1576_v33 }
 0x545   :  { %1652 = vmatprep.subr.mxu0 %v1507_v14  ;;  %1721 = vmatprep.subr.mxu1 %v1580_v47 }
 0x546   :  { %1653 = vmatpush1.msra.mxu0 %v1506_v19  ;;  %1722 = vmatpush1.msra.mxu1 %v1579_v11 }
 0x547   :  { %v1430_v45 = vpop.permute.xlu1 %1429  ;;  %v1359_v26 = vpop.permute.xlu0 %1358 }
 0x548   :  { %v1436_v15 = vsel %vm4237_vm3, %v1428_v44, %v1430_v45 }
 0x549   :  { %1654 = vmatprep.subr.mxu0 %v1436_v15 }
 0x54a   :  { %1655 = vmatpush1.msra.mxu0 %v1435_v43 }
 0x54b   :  { %v1357_v49 = vpop.permute.xlu1 %1356  ;;  %v1286_v48 = vpop.permute.xlu0 %1285 }
 0x54c   :  { %v1364_v29 = vsel %vm4238_vm0, %v1355_v41, %v1357_v49  ;;  %v1365_v51 = vsel %vm4238_vm0, %v1357_v49, %v1359_v26  ;;  %v1293_v31 = vsel %vm4240_vm8, %v1284_v34, %v1286_v48  ;;  %v1000_v41 = vrot.slane %v991_v16, %v2971_v4  ;;  %vm4249_vm8 = vmmov %vm4241_vm9 }
 0x54d   :  { %1656 = vmatprep.subr.mxu0 %v1365_v51  ;;  %v996_v34 = vrot.slane %v991_v16, %v2969_v3 }
 0x54e   :  { %1657 = vmatpush1.msra.mxu0 %v1364_v29  ;;  %v1014_v63 = vmul.f32 %v1000_v41, %v3523_v37  ;;  %v1004_v37 = vrot.slane %v991_v16, %v2973_v5 }
 0x54f   :  { %v1503_v17 = vpop.permute.xlu1 %1502  ;;  %v1432_v21 = vpop.permute.xlu0 %1431 }
 0x550   :  { %v1508_v18 = vsel %vm4236_vm15, %v1501_v7, %v1503_v17  ;;  %v1509_v28 = vsel %vm4236_vm15, %v1503_v17, %v1505_v27  ;;  %v1438_v54 = vsel %vm4237_vm3, %v1432_v21, %v1434_v1  ;;  %v1437_v9 = vsel %vm4237_vm3, %v1430_v45, %v1432_v21 }
 0x551   :  { %1723 = vmatprep.subr.mxu1 %v1509_v28  ;;  %v1013_v7 = vmul.f32 %v3472_v59, %v996_v34  ;;  %v1015_v14 = vmul.f32 %v1004_v37, %v3535_v40 }
 0x552   :  { %1724 = vmatpush1.msra.mxu1 %v1508_v18 }
 0x553   :  { %v1288_v25 = vpop.permute.xlu1 %1287  ;;  %1725 = vmatprep.subr.mxu1 %v1438_v54  ;;  %v1217_v23 = vpop.permute.xlu0 %1216 }
 0x554   :  { %1726 = vmatpush1.msra.mxu1 %v1437_v9  ;;  %v1294_v20 = vsel %vm4239_vm7, %v1286_v48, %v1288_v25  ;;  %vm1632_vm7 = vcmask 588800  }
 0x555   :  { %1658 = vmatprep.subr.mxu0 %v1294_v20 }
 0x556   :  { %1659 = vmatpush1.msra.mxu0 %v1293_v31 }
 0x557   :  { %v1215_v52 = vpop.permute.xlu1 %1214  ;;  %v1144_v30 = vpop.permute.xlu0 %1143 }
 0x558   :  { %v1222_v32 = vsel %vm4241_vm9, %v1213_v53, %v1215_v52  ;;  %v1223_v35 = vsel %vm4242_vm10, %v1215_v52, %v1217_v23  ;;  %v1151_v27 = vsel %vm4246_vm5, %v3662_v55, %v1144_v30  ;;  %v1589_v55 = vld [vmem:[#allocation11] sm:$0xff]  ;;  %vm4250_vm9 = vmmov %vm4249_vm8 }
 0x559   :  { %1660 = vmatprep.subr.mxu0 %v1223_v35  ;;  %vm4251_vm10 = vmmov %vm4246_vm5 }
 0x55a   :  { %1661 = vmatpush1.msra.mxu0 %v1222_v32 }
 0x55b   :  { %v1361_v24 = vpop.permute.xlu1 %1360  ;;  %v1290_v36 = vpop.permute.xlu0 %1289 }
 0x55c   :  { %v1366_v13 = vsel %vm4238_vm0, %v1359_v26, %v1361_v24  ;;  %v1367_v57 = vsel %vm4238_vm0, %v1361_v24, %v3660_v46  ;;  %v1296_v8 = vsel %vm4243_vm11, %v1290_v36, %v3664_v56  ;;  %v1295_v58 = vsel %vm4244_vm12, %v1288_v25, %v1290_v36  ;;  %vm4252_vm11 = vmmov %vm4246_vm5 }
 0x55d   :  { %1727 = vmatprep.subr.mxu1 %v1367_v57  ;;  %vm4253_vm12 = vmmov %vm4247_vm2 }
 0x55e   :  { %1728 = vmatpush1.msra.mxu1 %v1366_v13  ;;  %v1798_v13 = vld [vmem:[%s4225_s7] sm:$0xff]  ;;  %s2880_s7 = smov [#allocation15]  }
 0x55f   :  { %v1146_v60 = vpop.permute.xlu1 %1145  ;;  %1729 = vmatprep.subr.mxu1 %v1296_v8  ;;  %v1075_v38 = vpop.permute.xlu0 %1074 }
 0x560   :  { %1730 = vmatpush1.msra.mxu1 %v1295_v58  ;;  %v1152_v33 = vsel %vm4245_vm13, %v1144_v30, %v1146_v60  ;;  %vm4254_vm13 = vmmov %vm4247_vm2 }
 0x561   :  { %1662 = vmatprep.subr.mxu0 %v1152_v33 }
 0x562   :  { %1663 = vmatpush1.msra.mxu0 %v1151_v27 }
 0x563   :  { %v1073_v1 = vpop.permute.xlu1 %1072  ;;  %v1148_v53 = vpop.permute.xlu0 %1147 }
 0x564   :  { %v1080_v46 = vsel %vm4247_vm2, %v3668_v10, %v1073_v1  ;;  %v1081_v56 = vsel %vm4248_vm6, %v1073_v1, %v1075_v38  ;;  %v1008_v10 = vrot.slane %v991_v16, %v2975_v6  ;;  %v1154_v59 = vsel %vm4251_vm10, %v1148_v53, %v3670_v12  ;;  %v1802_v16 = vld [vmem:[%s4226_s8] sm:$0xff]  ;;  %s2508_s8 = sshll.u32 %s2880_s7, 4  ;;  %s2509_s8 = int_to_ptr.vmem [resolvable:$true] %s2508_s8 }
 0x565   :  { %1664 = vmatprep.subr.mxu0 %v1081_v56  ;;  %v1153_v62 = vsel %vm4252_vm11, %v1146_v60, %v1148_v53  ;;  %p2831_p12 = scmp.lt.s32.totalorder %s2509_s8, %s2509_s8 }
 0x566   :  { %1665 = vmatpush1.msra.mxu0 %v1080_v46  ;;  %v1016_v11 = vmul.f32 %v1008_v10, %v3555_v61 }
 0x567   :  { %v1219_v2 = vpop.permute.xlu1 %1218  ;;  %1666 = vmatprep.subr.mxu0 %v1014_v63  ;;  %v1077_v42 = vpop.permute.xlu0 %1076 }
 0x568   :  { %v1224_v44 = vsel %vm4249_vm8, %v1217_v23, %v1219_v2  ;;  %1667 = vmatpush1.msra.mxu0 %v1013_v7  ;;  %v1225_v50 = vsel %vm4250_vm9, %v1219_v2, %v3666_v0  ;;  %v1082_v0 = vsel %vm4254_vm13, %v1075_v38, %v1077_v42 }
 0x569   :  { %2541 = vmatmul.mubr.msk.f32.vlgmr.msra.gmra.mxu0 %vm1632_vm7, %v1589_v55  ;;  %1731 = vmatprep.subr.mxu1 %v1225_v50 }
 0x56a   :  { %1732 = vmatpush1.msra.mxu1 %v1224_v44 }
 0x56b   :  { %v1079_v39 = vpop.permute.xlu1 %1078  ;;  %1733 = vmatprep.subr.mxu1 %v1154_v59 }
 0x56c   :  { %1734 = vmatpush1.msra.mxu1 %v1153_v62  ;;  %v1083_v19 = vsel %vm4253_vm12, %v1077_v42, %v1079_v39 }
 0x56d   :  { %1735 = vmatprep.subr.mxu1 %v1083_v19 }
 0x56e   :  { %1736 = vmatpush1.msra.mxu1 %v1082_v0 }
 0x56f   :  { %1737 = vmatprep.subr.mxu1 %v1016_v11 }
 0x570   :  { %1738 = vmatpush1.msra.mxu1 %v1015_v14 }
 0x571   :  { %2542 = vmatmul.mubr.msk.f32.vlgmr.msra.gmra.mxu1 %vm1632_vm7, %v1589_v55 }
 0x574   :  { %v1630_v45 = vpop.permute.xlu0 %1629 }
 0x629   :  { %v1702_v12 = vpop.f32.mrf.mxu0 }
 0x62a   :  { %v1703_v15 = vadd.f32 %v1702_v12, %v1630_v45 }
 0x62b   :  { %v1704_v47 = vpop.f32.mrf.mxu0 }
 0x62c   :  { %v1705_v26 = vadd.f32 %v1704_v47, %v1630_v45 }
 0x62e   :  { %v1778_v49 = vadd.f32 %v1705_v26, %v1703_v15 }
 0x631   :  { %v1773_v43 = vpop.f32.mrf.mxu1 }
 0x632   :  { %v1774_v48 = vadd.f32 %v1773_v43, %v1630_v45  ;;  %v2327_v43 = vld [vmem:[#allocation14 + $0xf0] sm:$0xff] }
 0x633   :  { %v1775_v29 = vpop.f32.mrf.mxu1 }
 0x634   :  { %v1779_v51 = vadd.f32 %v1778_v49, %v1774_v48  ;;  %v1776_v17 = vadd.f32 %v1775_v29, %v1630_v45  ;;  %v2328_v45 = vld [vmem:[#allocation14 + $0xf8] sm:$0xff] }
 0x635   :  { %2543 = vmatprep.subr.mxu0 %v2328_v45  ;;  %v2360_v49 = vld [vmem:[#allocation14 + $0x1f8] sm:$0xff] }
 0x636   :  { %v1780_v21 = vadd.f32 %v1779_v51, %v1776_v17  ;;  %2578 = vmatprep.subr.mxu1 %v2360_v49  ;;  %v2344_v29 = vld [vmem:[#allocation14 + $0x178] sm:$0xff]  ;;  %v2326_v51 = vld [vmem:[#allocation14 + $0xe8] sm:$0xff] }
 0x637   :  { %2579 = vmatpush3.msra.mxu1 %v2344_v29  ;;  %v2332_v45 = vld [vmem:[#allocation14 + $0x118] sm:$0xff]  ;;  %v2298_v49 = vld [vmem:[#allocation14 + $0x8] sm:$0xff]  ;;  %v2313_v29 = vld [vmem:[#allocation14 + $0x80] sm:$0xff] }
 0x638   :  { %1781 = vadd.xlane.f32.xlu1 %v1780_v21  ;;  %v2359_v21 = vld [vmem:[#allocation14 + $0x1f0] sm:$0xff] }
 0x639   :  { %2580 = vmatprep.subr.mxu1 %v2359_v21  ;;  %v2330_v21 = vld [vmem:[#allocation14 + $0x108] sm:$0xff] }
 0x6c1   :  { %v1782_v61 = vpop.xlane.xlu1 %1781 }
 0x6c2   :  { %v1783_v18 = vmul.f32 0.001953125, %v1782_v61  ;;  %v2310_v61 = vld [vmem:[#allocation14 + $0x68] sm:$0xff] }
 0x6c4   :  { %v1784_v40 = vsub.f32 %v1703_v15, %v1783_v18  ;;  %v1785_v28 = vsub.f32 %v1705_v26, %v1783_v18  ;;  %v1786_v54 = vsub.f32 %v1774_v48, %v1783_v18  ;;  %v1787_v9 = vsub.f32 %v1776_v17, %v1783_v18 }
 0x6c6   :  { %v1788_v25 = vmul.f32 %v1784_v40, %v1784_v40  ;;  %v1789_v23 = vmul.f32 %v1785_v28, %v1785_v28  ;;  %v1790_v20 = vmul.f32 %v1786_v54, %v1786_v54  ;;  %v1791_v52 = vmul.f32 %v1787_v9, %v1787_v9  ;;  %v2325_v40 = vld [vmem:[#allocation14 + $0xe0] sm:$0xff]  ;;  %v2358_v28 = vld [vmem:[#allocation14 + $0x1e8] sm:$0xff] }
 0x6c7   :  { %v2309_v54 = vld [vmem:[#allocation14 + $0x60] sm:$0xff]  ;;  %v2342_v9 = vld [vmem:[#allocation14 + $0x168] sm:$0xff] }
 0x6c8   :  { %v1792_v31 = vadd.f32 %v1789_v23, %v1788_v25  ;;  %v2324_v25 = vld [vmem:[#allocation14 + $0xd8] sm:$0xff]  ;;  %v2357_v23 = vld [vmem:[#allocation14 + $0x1e0] sm:$0xff] }
 0x6ca   :  { %v1793_v30 = vadd.f32 %v1792_v31, %v1790_v20  ;;  %v2308_v20 = vld [vmem:[#allocation14 + $0x58] sm:$0xff]  ;;  %v2341_v31 = vld [vmem:[#allocation14 + $0x160] sm:$0xff] }
 0x6cc   :  { %v1794_v32 = vadd.f32 %v1793_v30, %v1791_v52  ;;  %v2323_v52 = vld [vmem:[#allocation14 + $0xd0] sm:$0xff]  ;;  %v2356_v30 = vld [vmem:[#allocation14 + $0x1d8] sm:$0xff] }
 0x6ce   :  { %1795 = vadd.xlane.f32.xlu0 %v1794_v32  ;;  %v2307_v32 = vld [vmem:[#allocation14 + $0x50] sm:$0xff] }
 0x757   :  { %v1796_v35 = vpop.xlane.xlu0 %1795 }
 0x758   :  { %v1797_v24 = vmul.f32 0.001953125, %v1796_v35  ;;  %v2340_v35 = vld [vmem:[#allocation14 + $0x158] sm:$0xff] }
 0x75a   :  { %v1799_v36 = vadd.f32 1e-05, %v1797_v24  ;;  %v2322_v24 = vld [vmem:[#allocation14 + $0xc8] sm:$0xff] }
 0x75c   :  { %2724 = vrsqrt.f32 %v1799_v36  ;;  %v2355_v36 = vld [vmem:[#allocation14 + $0x1d0] sm:$0xff] }
 0x769   :  { %v2725_v57 = vpop.eup %2724 }
 0x76a   :  { %v1801_v8 = vmul.f32 %v2725_v57, %v1798_v13  ;;  %v2306_v13 = vld [vmem:[#allocation14 + $0x48] sm:$0xff]  ;;  %v2339_v57 = vld [vmem:[#allocation14 + $0x150] sm:$0xff] }
 0x76c   :  { %1807 = vperm.xlu0 %2640, %v1801_v8   ;;  %v1803_v58 = vmul.f32 %v1801_v8, %v1783_v18  ;;  %v2343_v18 = vld [vmem:[#allocation14 + $0x170] sm:$0xff]  ;;  %v2321_v8 = vld [vmem:[#allocation14 + $0xc0] sm:$0xff] }
 0x76d   :  { %2581 = vmatpush3.msra.mxu1 %v2343_v18  ;;  %v1864_v18 = vld [vmem:[#allocation12] ss:$8 sm:$0xf] }
 0x76e   :  { %v1804_v60 = vsub.f32 %v1802_v16, %v1803_v58  ;;  %2582 = vmatprep.subr.mxu1 %v2358_v28  ;;  %v2354_v16 = vld [vmem:[#allocation14 + $0x1c8] sm:$0xff]  ;;  %v2305_v58 = vld [vmem:[#allocation14 + $0x40] sm:$0xff] }
 0x76f   :  { %2583 = vmatpush3.msra.mxu1 %v2342_v9 }
 0x770   :  { %1816 = vperm.xlu1 %2641, %v1804_v60   ;;  %2584 = vmatprep.subr.mxu1 %v2357_v23  ;;  %v2338_v60 = vld [vmem:[#allocation14 + $0x148] sm:$0xff] }
 0x771   :  { %2585 = vmatpush3.msra.mxu1 %v2341_v31  ;;  %v1948_v23 = vld [vmem:[#allocation12 + $0x2] ss:$8 sm:$0xf] }
 0x772   :  { %2586 = vmatprep.subr.mxu1 %v2356_v30  ;;  %vm1949_vm8 = vcmp.gt.f32.partialorder %v1948_v23, 0.5 }
 0x773   :  { %2587 = vmatpush3.msra.mxu1 %v2340_v35  ;;  %v2048_v35 = vld [vmem:[#allocation12 + $0x4] ss:$8 sm:$0xf] }
 0x774   :  { %2588 = vmatprep.subr.mxu1 %v2355_v36 }
 0x775   :  { %2589 = vmatpush3.msra.mxu1 %v2339_v57 }
 0x776   :  { %2590 = vmatprep.subr.mxu1 %v2354_v16 }
 0x777   :  { %2591 = vmatpush3.msra.mxu1 %v2338_v60  ;;  %v2098_v60 = vld [vmem:[#allocation12 + $0x5] ss:$8 sm:$0xf] }
 0x7e7   :  { %v1808_v38 = vpop.permute.xlu0 %1807 }
 0x7e8   :  { %v1810_v33 = vmul.f32 %v1808_v38, %v1703_v15  ;;  %v1811_v27 = vmul.f32 %v1808_v38, %v1705_v26  ;;  %v1812_v41 = vmul.f32 %v1808_v38, %v1774_v48  ;;  %v1813_v34 = vmul.f32 %v1808_v38, %v1776_v17  ;;  %v2312_v26 = vld [vmem:[#allocation14 + $0x78] sm:$0xff]  ;;  %v2311_v48 = vld [vmem:[#allocation14 + $0x70] sm:$0xff] }
 0x7e9   :  { %2544 = vmatpush3.msra.mxu0 %v2312_v26  ;;  %v2320_v38 = vld [vmem:[#allocation14 + $0xb8] sm:$0xff]  ;;  %v2314_v26 = vld [vmem:[#allocation14 + $0x88] sm:$0xff] }
 0x7ea   :  { %2545 = vmatprep.subr.mxu0 %v2327_v43  ;;  %v2347_v43 = vld [vmem:[#allocation14 + $0x190] sm:$0xff] }
 0x7eb   :  { %v1817_v1 = vpop.permute.xlu1 %1816  ;;  %2546 = vmatpush3.msra.mxu0 %v2311_v48  ;;  %v2331_v48 = vld [vmem:[#allocation14 + $0x110] sm:$0xff] }
 0x7ec   :  { %v1819_v46 = vadd.f32 %v1817_v1, %v1810_v33  ;;  %v1820_v53 = vadd.f32 %v1817_v1, %v1811_v27  ;;  %v1821_v56 = vadd.f32 %v1817_v1, %v1812_v41  ;;  %v1822_v63 = vadd.f32 %v1817_v1, %v1813_v34  ;;  %2547 = vmatprep.subr.mxu0 %v2326_v51  ;;  %v2353_v33 = vld [vmem:[#allocation14 + $0x1c0] sm:$0xff]  ;;  %v2304_v27 = vld [vmem:[#allocation14 + $0x38] sm:$0xff]  ;;  %v2319_v34 = vld [vmem:[#allocation14 + $0xb0] sm:$0xff] }
 0x7ed   :  { %2548 = vmatpush3.msra.mxu0 %v2310_v61  ;;  %v2337_v41 = vld [vmem:[#allocation14 + $0x140] sm:$0xff]  ;;  %2592 = vmatprep.subr.mxu1 %v2353_v33  ;;  %v2352_v1 = vld [vmem:[#allocation14 + $0x1b8] sm:$0xff]  ;;  %v2346_v51 = vld [vmem:[#allocation14 + $0x188] sm:$0xff] }
 0x7ee   :  { %vm1824_vm5 = vcmp.gt.f32.partialorder %v1820_v53, 0.0  ;;  %v1828_v7 = vmul.f32 0.2, %v1820_v53  ;;  %vm1823_vm2 = vcmp.gt.f32.partialorder %v1819_v46, 0.0  ;;  %v1827_v55 = vmul.f32 0.2, %v1819_v46  ;;  %2549 = vmatprep.subr.mxu0 %v2325_v40  ;;  %2593 = vmatpush3.msra.mxu1 %v2337_v41 }
 0x7ef   :  { %v1830_v50 = vmul.f32 0.2, %v1822_v63  ;;  %v1829_v10 = vmul.f32 0.2, %v1821_v56  ;;  %vm1826_vm6 = vcmp.gt.f32.partialorder %v1822_v63, 0.0  ;;  %vm1825_vm7 = vcmp.gt.f32.partialorder %v1821_v56, 0.0  ;;  %2550 = vmatpush3.msra.mxu0 %v2309_v54  ;;  %2594 = vmatprep.subr.mxu1 %v2352_v1 }
 0x7f0   :  { %v1832_v2 = vsel %vm1824_vm5, %v1820_v53, %v1828_v7  ;;  %v1831_v44 = vsel %vm1823_vm2, %v1819_v46, %v1827_v55  ;;  %2551 = vmatprep.subr.mxu0 %v2324_v25  ;;  %v2303_v46 = vld [vmem:[#allocation14 + $0x30] sm:$0xff]  ;;  %v2336_v53 = vld [vmem:[#allocation14 + $0x138] sm:$0xff]  ;;  %v2302_v7 = vld [vmem:[#allocation14 + $0x28] sm:$0xff]  ;;  %vm2049_vm5 = vcmp.gt.f32.partialorder %v2048_v35, 0.5  ;;  %vm2099_vm2 = vcmp.gt.f32.partialorder %v2098_v60, 0.5 }
 0x7f1   :  { %1841 = vrot.lane.b32.xlu0 %v1832_v2, %s2864_s29  ;;  %1839 = vrot.lane.b32.xlu1 %v1831_v44, %s2864_s29  ;;  %v1834_v42 = vsel %vm1826_vm6, %v1822_v63, %v1830_v50  ;;  %v1833_v59 = vsel %vm1825_vm7, %v1821_v56, %v1829_v10  ;;  %v2318_v56 = vld [vmem:[#allocation14 + $0xa8] sm:$0xff]  ;;  %v2351_v63 = vld [vmem:[#allocation14 + $0x1b0] sm:$0xff]  ;;  %v2317_v2 = vld [vmem:[#allocation14 + $0xa0] sm:$0xff] }
 0x7f2   :  { %2552 = vmatpush3.msra.mxu0 %v2308_v20  ;;  %2595 = vmatpush3.msra.mxu1 %v2336_v53  ;;  %v2335_v55 = vld [vmem:[#allocation14 + $0x130] sm:$0xff]  ;;  %v2350_v44 = vld [vmem:[#allocation14 + $0x1a8] sm:$0xff]  ;;  %v2301_v50 = vld [vmem:[#allocation14 + $0x20] sm:$0xff] }
 0x7f3   :  { %2553 = vmatprep.subr.mxu0 %v2323_v52  ;;  %2596 = vmatprep.subr.mxu1 %v2351_v63  ;;  %v2334_v10 = vld [vmem:[#allocation14 + $0x128] sm:$0xff]  ;;  %v2345_v61 = vld [vmem:[#allocation14 + $0x180] sm:$0xff] }
 0x7f4   :  { %2554 = vmatpush3.msra.mxu0 %v2307_v32  ;;  %2597 = vmatpush3.msra.mxu1 %v2335_v55  ;;  %v1893_v40 = vld [vmem:[#allocation12 + $0x1] ss:$8 sm:$0xf]  ;;  %v1998_v32 = vld [vmem:[#allocation12 + $0x3] ss:$8 sm:$0xf] }
 0x7f5   :  { %1845 = vrot.lane.b32.xlu0 %v1834_v42, %s2864_s29  ;;  %1843 = vrot.lane.b32.xlu1 %v1833_v59, %s2864_s29  ;;  %v2316_v42 = vld [vmem:[#allocation14 + $0x98] sm:$0xff]  ;;  %v2349_v59 = vld [vmem:[#allocation14 + $0x1a0] sm:$0xff]  ;;  %vm1999_vm13 = vcmp.gt.f32.partialorder %v1998_v32, 0.5  ;;  %s2826_s29 = scalar_lea.vmem %s2509_s8, 128 }
 0x7f6   :  { %2555 = vmatprep.subr.mxu0 %v2322_v24  ;;  %2598 = vmatprep.subr.mxu1 %v2350_v44  ;;  %v2148_v1 = vld [vmem:[#allocation12 + $0x6] ss:$8 sm:$0xf]  ;;  %p2827_p11 = scmp.ne.s32.totalorder %s2509_s8, %s2826_s29  ;;  %p2832_p13 = scmp.lt.s32.totalorder %s2826_s29, %s2826_s29 }
 0x7f7   :  { %2556 = vmatpush3.msra.mxu0 %v2306_v13  ;;  %2599 = vmatpush3.msra.mxu1 %v2334_v10  ;;  %v3862_v10 = vsel %vm2049_vm5, 1, %v2879_v22 }
 0x7f8   :  { %2557 = vmatprep.subr.mxu0 %v2321_v8  ;;  %2600 = vmatprep.subr.mxu1 %v2349_v59  ;;  %v2066_v23 = vrot.slane %v3862_v10, %v2975_v6  ;;  %p2833_p0 = por %p2832_p13, %p2831_p12 }
 0x7f9   :  { %2558 = vmatpush3.msra.mxu0 %v2305_v58 }
 0x7fa   :  { %2559 = vmatprep.subr.mxu0 %v2320_v38  ;;  %v1950_v38 = vsel %vm1949_vm8, 1, %v2879_v22  ;;  %p2834_p1 = pnand %p2833_p0, %p2827_p11 }
 0x7fb   :  { %2560 = vmatpush3.msra.mxu0 %v2304_v27  ;;  %v1958_v44 = vrot.slane %v1950_v38, %v2971_v4 }
 0x7fc   :  { %2561 = vmatprep.subr.mxu0 %v2319_v34 }
 0x7fd   :  { %2562 = vmatpush3.msra.mxu0 %v2303_v46  ;;  %vm3926_vm15 = vcmp.eq.s32.totalorder %v1958_v44, 1 }
 0x7fe   :  { %2563 = vmatprep.subr.mxu0 %v2318_v56 }
 0x7ff   :  { %2564 = vmatpush3.msra.mxu0 %v2302_v7  ;;  %v3850_v7 = vsel %vm1999_vm13, 1, %v2879_v22 }
 0x800   :  { %2565 = vmatprep.subr.mxu0 %v2317_v2  ;;  %v1954_v2 = vrot.slane %v1950_v38, %v2969_v3 }
 0x801   :  { %2566 = vmatpush3.msra.mxu0 %v2301_v50 }
 0x802   :  { %2567 = vmatprep.subr.mxu0 %v2316_v42  ;;  %v2198_v42 = vld [vmem:[#allocation12 + $0x7] ss:$8 sm:$0xf]  ;;  %vm3893_vm5 = vcmp.eq.s32.totalorder %v1954_v2, 1 }
 0x803   :  { %vm2199_vm13 = vcmp.gt.f32.partialorder %v2198_v42, 0.5 }
 0x804   :  { %v3924_v35 = vsel %vm2199_vm13, 1, %v2879_v22  ;;  %vm4281_vm13 = vcmask 1039360  }
 0x863   :  { %v1842_v37 = vpop.permute.xlu0 %1841  ;;  %v1840_v62 = vpop.permute.xlu1 %1839 }
 0x864   :  { %v3734_v39 = vsel %vm118_vm1, %v1840_v62, %v1842_v37  ;;  %1855 = vst.msk [vmem:[#allocation4] sm:$0xff] %vm981_vm4, %v1840_v62  ;;  %v2333_v62 = vld [vmem:[#allocation14 + $0x120] sm:$0xff]  ;;  %vm1894_vm4 = vcmp.gt.f32.partialorder %v1893_v40, 0.5 }
 0x865   :  { %2601 = vmatpush3.msra.mxu1 %v2333_v62  ;;  %v1895_v30 = vsel %vm1894_vm4, 1, %v2879_v22  ;;  %v1962_v62 = vrot.slane %v1950_v38, %v2973_v5  ;;  %vm2149_vm4 = vcmp.gt.f32.partialorder %v2148_v1, 0.5  ;;  %v4284_v1 = vmov 0 }
 0x866   :  { %v1911_v8 = vrot.slane %v1895_v30, %v2975_v6  ;;  %v1899_v33 = vrot.slane %v1895_v30, %v2969_v3  ;;  %v1907_v27 = vrot.slane %v1895_v30, %v2973_v5  ;;  %v1903_v34 = vrot.slane %v1895_v30, %v2971_v4 }
 0x867   :  { %v1846_v19 = vpop.permute.xlu0 %1845  ;;  %v1844_v0 = vpop.permute.xlu1 %1843  ;;  %v3901_v40 = vsel %vm2149_vm4, 1, %v2879_v22 }
 0x868   :  { %1859 = vst.msk [vmem:[#allocation4 + $0x20] sm:$0xff] %vm118_vm1, %v1846_v19  ;;  %v3739_v11 = vsel %vm118_vm1, %v1842_v37, %v1844_v0  ;;  %v3742_v14 = vsel %vm118_vm1, %v1844_v0, %v1846_v19  ;;  %v2300_v37 = vld [vmem:[#allocation14 + $0x18] sm:$0xff]  ;;  %v2315_v19 = vld [vmem:[#allocation14 + $0x90] sm:$0xff]  ;;  %vm1865_vm1 = vcmp.gt.f32.partialorder %v1864_v18, 0.5  ;;  %vm3852_vm6 = vcmp.eq.s32.totalorder %v1911_v8, 1 }
 0x869   :  { %v3767_v17 = vpack.i.bf16 %v3739_v11, %v3734_v39  ;;  %v2348_v0 = vld [vmem:[#allocation14 + $0x198] sm:$0xff]  ;;  %2568 = vmatpush3.msra.mxu0 %v2300_v37  ;;  %v1866_v28 = vsel %vm1865_vm1, 1, %v2879_v22  ;;  %vm3864_vm7 = vcmp.eq.s32.totalorder %v1899_v33, 1  ;;  %vm3868_vm1 = vcmp.eq.s32.totalorder %v1907_v27, 1 }
 0x86a   :  { %2569 = vmatprep.subr.mxu0 %v2315_v19  ;;  %2602 = vmatprep.subr.mxu1 %v2348_v0  ;;  %v1882_v25 = vrot.slane %v1866_v28, %v2975_v6  ;;  %v1874_v20 = vrot.slane %v1866_v28, %v2971_v4  ;;  %v1870_v31 = vrot.slane %v1866_v28, %v2969_v3  ;;  %vm3873_vm8 = vcmp.eq.s32.totalorder %v1903_v34, 1 }
 0x86b   :  { %v3744_v12 = vld [vmem:[#allocation4] sm:$0xff]  ;;  %2603 = vmatpush3.msra.mxu1 %v2332_v45  ;;  %v1878_v52 = vrot.slane %v1866_v28, %v2973_v5  ;;  %v2016_v0 = vrot.slane %v3850_v7, %v2975_v6  ;;  %v2004_v45 = vrot.slane %v3850_v7, %v2969_v3  ;;  %v2058_v18 = vrot.slane %v3862_v10, %v2971_v4 }
 0x86c   :  { %1971 = vrot.lane.b32.xlu0 %v3744_v12, %s2874_s18  ;;  %1921 = vrot.lane.b32.xlu1 %v3744_v12, %s2878_s10  ;;  %vm3815_vm9 = vcmp.eq.s32.totalorder %v1882_v25, 1  ;;  %vm3819_vm10 = vcmp.eq.s32.totalorder %v1874_v20, 1  ;;  %vm3824_vm11 = vcmp.eq.s32.totalorder %v1870_v31, 1  ;;  %v2062_v25 = vrot.slane %v3862_v10, %v2973_v5 }
 0x86d   :  { %2604 = vmatprep.subr.mxu1 %v2347_v43  ;;  %vm3828_vm12 = vcmp.eq.s32.totalorder %v1878_v52, 1  ;;  %v1888_v41 = vsel %vm3819_vm10, %v3734_v39, -inf  ;;  %v1890_v56 = vsel %vm3815_vm9, %v3742_v14, -inf  ;;  %v1887_v50 = vsel %vm3824_vm11, %v3744_v12, -inf }
 0x86e   :  { %2605 = vmatpush3.msra.mxu1 %v2331_v48  ;;  %v1889_v63 = vsel %vm3828_vm12, %v3739_v11, -inf  ;;  %v2054_v48 = vrot.slane %v3862_v10, %v2969_v3  ;;  %v4277_v8 = vmov 0  ;;  %vm3930_vm3 = vcmp.eq.s32.totalorder %v2016_v0, 1 }
 0x86f   :  { %v1891_v47 = vld [vmem:[#allocation4 + $0x20] sm:$0xff]  ;;  %2606 = vmatprep.subr.mxu1 %v2346_v51  ;;  %v2012_v51 = vrot.slane %v3850_v7, %v2973_v5  ;;  %v4278_v8 = vsel %vm3926_vm15, 4294967295, %v4277_v8  ;;  %v4279_v33 = vmov 0  ;;  %v2154_v27 = vrot.slane %v3901_v40, %v2969_v3 }
 0x870   :  { %2071 = vrot.lane.b32.xlu0 %v3744_v12, %s2873_s16  ;;  %2021 = vrot.lane.b32.xlu1 %v3744_v12, %s2877_s21  ;;  %v3759_v15 = vpack.i.bf16 %v1891_v47, %v3742_v14  ;;  %v2299_v47 = vld [vmem:[#allocation14 + $0x10] sm:$0xff]  ;;  %v4280_v33 = vsel %vm3930_vm3, 4294967295, %v4279_v33  ;;  %v2158_v34 = vrot.slane %v3901_v40, %v2971_v4  ;;  %vm3958_vm3 = vcmp.eq.s32.totalorder %v2054_v48, 1 }
 0x871   :  { %2570 = vmatpush3.msra.mxu0 %v2299_v47  ;;  %2607 = vmatpush3.msra.mxu1 %v2330_v21  ;;  %v1966_v47 = vrot.slane %v1950_v38, %v2975_v6  ;;  %vm3945_vm0 = vcmp.eq.s32.totalorder %v2012_v51, 1  ;;  %v4285_v1 = vsel %vm3958_vm3, 4294967295, %v4284_v1  ;;  %vm3962_vm15 = vcmp.eq.s32.totalorder %v2004_v45, 1 }
 0x872   :  { %2571 = vmatprep.subr.mxu0 %v2314_v26  ;;  %2608 = vmatprep.subr.mxu1 %v2345_v61  ;;  %v3883_v26 = vsel %vm2099_vm2, 1, %v2879_v22  ;;  %vm3911_vm2 = vcmp.eq.s32.totalorder %v1962_v62, 1  ;;  %v4286_v51 = vmov 0  ;;  %vm4295_vm9 = vcmask 916480  }
 0x873   :  { %2572 = vmatpush3.msra.mxu0 %v2298_v49  ;;  %v2116_v28 = vrot.slane %v3883_v26, %v2975_v6  ;;  %v2104_v20 = vrot.slane %v3883_v26, %v2969_v3  ;;  %vm3915_vm14 = vcmp.eq.s32.totalorder %v1966_v47, 1  ;;  %v2108_v30 = vrot.slane %v3883_v26, %v2971_v4 }
 0x874   :  { %2171 = vrot.lane.b32.xlu0 %v3744_v12, %s2872_s15  ;;  %2121 = vrot.lane.b32.xlu1 %v3744_v12, %s2876_s20  ;;  %v2112_v32 = vrot.slane %v3883_v26, %v2973_v5  ;;  %v4287_v51 = vsel %vm3962_vm15, 4294967295, %v4286_v51  ;;  %vm3978_vm15 = vcmp.eq.s32.totalorder %v2058_v18, 1  ;;  %vm4306_vm10 = vnez %v4278_v8 }
 0x875   :  { %2573 = vmatprep.subr.mxu0 %v2313_v29  ;;  %v2008_v29 = vrot.slane %v3850_v7, %v2971_v4  ;;  %vm4013_vm11 = vcmp.eq.s32.totalorder %v2116_v28, 1 }
 0x877   :  { %vm3982_vm3 = vcmp.eq.s32.totalorder %v2008_v29, 1 }
 0x878   :  { %2221 = vrot.lane.b32.xlu1 %v3744_v12, %s2875_s1  ;;  %2648 = vrot.lane.b32.xlu0 %v3759_v15, %s2878_s10 }
 0x87c   :  { %2653 = vrot.lane.b32.xlu0 %v3767_v17, %s2874_s18  ;;  %2643 = vrot.lane.b32.xlu1 %v3767_v17, %s2878_s10 }
 0x880   :  { %2668 = vrot.lane.b32.xlu0 %v3759_v15, %s2877_s21  ;;  %2658 = vrot.lane.b32.xlu1 %v3759_v15, %s2874_s18 }
 0x884   :  { %2673 = vrot.lane.b32.xlu0 %v3767_v17, %s2873_s16  ;;  %2663 = vrot.lane.b32.xlu1 %v3767_v17, %s2877_s21 }
 0x888   :  { %2688 = vrot.lane.b32.xlu0 %v3759_v15, %s2876_s20  ;;  %2678 = vrot.lane.b32.xlu1 %v3759_v15, %s2873_s16 }
 0x88c   :  { %2693 = vrot.lane.b32.xlu0 %v3767_v17, %s2872_s15  ;;  %2683 = vrot.lane.b32.xlu1 %v3767_v17, %s2876_s20 }
 0x890   :  { %2708 = vrot.lane.b32.xlu0 %v3759_v15, %s2875_s1  ;;  %2698 = vrot.lane.b32.xlu1 %v3759_v15, %s2872_s15 }
 0x894   :  { %2713 = vrot.lane.b32.xlu0 %v3767_v17, %s2871_s14  ;;  %2703 = vrot.lane.b32.xlu1 %v3767_v17, %s2875_s1  ;;  %v2297_v17 = vld [vmem:[#allocation14] sm:$0xff] }
 0x895   :  { %2574 = vmatpush3.msra.mxu0 %v2297_v17  ;;  %v2248_v17 = vld [vmem:[#allocation12 + $0x20] ss:$8 sm:$0xf] }
 0x896   :  { %vm2249_vm4 = vcmp.gt.f32.partialorder %v2248_v17, 0.5 }
 0x898   :  { %2271 = vrot.lane.b32.xlu0 %v3744_v12, %s2871_s14  ;;  %2718 = vrot.lane.b32.xlu1 %v3759_v15, %s2871_s14  ;;  %v2329_v15 = vld [vmem:[#allocation14 + $0x100] sm:$0xff] }
 0x899   :  { %2609 = vmatpush3.msra.mxu1 %v2329_v15 }
 0x8de   :  { %v3802_v54 = vpop.permute.xlu0 %1971  ;;  %v3804_v9 = vpop.permute.xlu1 %1921 }
 0x8e2   :  { %v3811_v24 = vpop.permute.xlu0 %2071  ;;  %v3813_v36 = vpop.permute.xlu1 %2021 }
 0x8e6   :  { %v3839_v46 = vpop.permute.xlu0 %2171  ;;  %v3841_v53 = vpop.permute.xlu1 %2121 }
 0x8ea   :  { %v2649_v43 = vpop.permute.xlu0 %2648  ;;  %v3885_v49 = vpop.permute.xlu1 %2221 }
 0x8eb   :  { %v2651_v21 = vunpack.i.h.bf16 %v2649_v43  ;;  %v2650_v61 = vunpack.i.l.bf16 %v2649_v43  ;;  %v3953_v43 = vsel %vm2249_vm4, 1, %v2879_v22  ;;  %vm4288_vm4 = vcmask 1031168  }
 0x8ec   :  { %v2258_v29 = vrot.slane %v3953_v43, %v2971_v4  ;;  %v2266_v19 = vrot.slane %v3953_v43, %v2975_v6  ;;  %vm4302_vm12 = vmmov %vm4288_vm4  ;;  %v4338_v12 = vrot.slane %v3953_v43, %v2969_v3 }
 0x8ed   :  { %v1934_v2 = vsel %vm4281_vm13, %v2650_v61, %v2651_v21 }
 0x8ee   :  { %v2654_v60 = vpop.permute.xlu0 %2653  ;;  %v2644_v38 = vpop.permute.xlu1 %2643 }
 0x8ef   :  { %v2655_v44 = vunpack.i.l.bf16 %v2654_v60  ;;  %v2646_v10 = vunpack.i.h.bf16 %v2644_v38  ;;  %v2645_v62 = vunpack.i.l.bf16 %v2644_v38  ;;  %v2656_v48 = vunpack.i.h.bf16 %v2654_v60 }
 0x8f0   :  { %v4325_v38 = vrot.slane %v3901_v40, %v2975_v6 }
 0x8f1   :  { %v1933_v7 = vsel %vm4281_vm13, %v2646_v10, %v2650_v61  ;;  %v1942_v61 = vsel %vm3852_vm6, %v1934_v2, -inf  ;;  %v1981_v21 = vsel %vm4288_vm4, %v3802_v54, %v2655_v44  ;;  %v1931_v45 = vsel %vm4281_vm13, %v3804_v9, %v2645_v62  ;;  %vm4293_vm6 = vmmov %vm4281_vm13 }
 0x8f2   :  { %v2669_v42 = vpop.permute.xlu0 %2668  ;;  %v2659_v47 = vpop.permute.xlu1 %2658  ;;  %v1941_v55 = vsel %vm3868_vm1, %v1933_v7, -inf  ;;  %v1932_v60 = vsel %vm4293_vm6, %v2645_v62, %v2646_v10  ;;  %v1939_v54 = vsel %vm3864_vm7, %v1931_v45, -inf  ;;  %v1946_v37 = vmax.f32 %v1890_v56, %v1942_v61  ;;  %vm4294_vm7 = vmmov %vm4288_vm4 }
 0x8f3   :  { %v2671_v2 = vunpack.i.h.bf16 %v2669_v42  ;;  %v1940_v9 = vsel %vm3873_vm8, %v1932_v60, -inf  ;;  %v2670_v18 = vunpack.i.l.bf16 %v2669_v42  ;;  %v2661_v17 = vunpack.i.h.bf16 %v2659_v47 }
 0x8f4   :  { %v1943_v59 = vmax.f32 %v1887_v50, %v1939_v54  ;;  %v2660_v7 = vunpack.i.l.bf16 %v2659_v47  ;;  %v1982_v10 = vsel %vm4294_vm7, %v2655_v44, %v2656_v48  ;;  %v1989_v42 = vsel %vm3893_vm5, %v1981_v21, -inf  ;;  %vm4303_vm5 = vmmov %vm4288_vm4 }
 0x8f5   :  { %v1945_v14 = vmax.f32 %v1889_v63, %v1941_v55  ;;  %v2034_v13 = vsel %vm4295_vm9, %v2670_v18, %v2671_v2  ;;  %vm4017_vm1 = vcmp.eq.s32.totalorder %v2062_v25, 1  ;;  %vm4021_vm8 = vcmp.eq.s32.totalorder %v2066_v23, 1 }
 0x8f6   :  { %v2674_v16 = vpop.permute.xlu0 %2673  ;;  %v2664_v56 = vpop.permute.xlu1 %2663  ;;  %v1944_v11 = vmax.f32 %v1888_v41, %v1940_v9  ;;  %v1983_v58 = vsel %vm4302_vm12, %v2656_v48, %v2660_v7  ;;  %v1984_v63 = vsel %vm4303_vm5, %v2660_v7, %v2661_v17  ;;  %vm4031_vm4 = vcmp.eq.s32.totalorder %v2154_v27, 1 }
 0x8f7   :  { %v2676_v28 = vunpack.i.h.bf16 %v2674_v16  ;;  %v1991_v25 = vsel %vm3911_vm2, %v1983_v58, -inf  ;;  %v1992_v23 = vsel %vm3915_vm14, %v1984_v63, -inf  ;;  %v2675_v62 = vunpack.i.l.bf16 %v2674_v16 }
 0x8f8   :  { %v2666_v57 = vunpack.i.h.bf16 %v2664_v56  ;;  %v1990_v39 = vsel %vm4306_vm10, %v1982_v10, -inf  ;;  %vm4307_vm13 = vnez %v4280_v33  ;;  %v2665_v47 = vunpack.i.l.bf16 %v2664_v56  ;;  %vm4318_vm10 = vmmov %vm4295_vm9 }
 0x8f9   :  { %v2042_v41 = vsel %vm4307_vm13, %v2034_v13, -inf  ;;  %v1993_v21 = vmax.f32 %v1943_v59, %v1989_v42  ;;  %vm4046_vm6 = vcmp.eq.s32.totalorder %v2104_v20, 1  ;;  %vm4053_vm14 = vcmp.eq.s32.totalorder %v2112_v32, 1 }
 0x8fa   :  { %v1995_v52 = vmax.f32 %v1945_v14, %v1991_v25  ;;  %vm4312_vm2 = vcmask 908288   ;;  %v2033_v17 = vsel %vm4295_vm9, %v2666_v57, %v2670_v18  ;;  %v2689_v61 = vpop.permute.xlu0 %2688  ;;  %v2679_v20 = vpop.permute.xlu1 %2678  ;;  %vm4064_vm12 = vcmp.eq.s32.totalorder %v2158_v34, 1 }
 0x8fb   :  { %v2081_v8 = vsel %vm4312_vm2, %v3811_v24, %v2675_v62  ;;  %vm4313_vm7 = vmmov %vm4312_vm2  ;;  %vm4071_vm5 = vcmp.eq.s32.totalorder %v2108_v30, 1  ;;  %v1996_v24 = vmax.f32 %v1946_v37, %v1992_v23  ;;  %v2041_v45 = vsel %vm3945_vm0, %v2033_v17, -inf }
 0x8fc   :  { %v2082_v33 = vsel %vm4313_vm7, %v2675_v62, %v2676_v28  ;;  %v1994_v55 = vmax.f32 %v1944_v11, %v1990_v39  ;;  %v2031_v60 = vsel %vm4318_vm10, %v3813_v36, %v2665_v47  ;;  %vm4319_vm13 = vnez %v4285_v1  ;;  %vm4320_vm2 = vmmov %vm4295_vm9 }
 0x8fd   :  { %v2089_v34 = vsel %vm4319_vm13, %v2081_v8, -inf  ;;  %v2032_v54 = vsel %vm4320_vm2, %v2665_v47, %v2666_v57  ;;  %vm4321_vm7 = vnez %v4287_v51  ;;  %v2691_v30 = vunpack.i.h.bf16 %v2689_v61 }
 0x8fe   :  { %v2039_v26 = vsel %vm4321_vm7, %v2031_v60, -inf  ;;  %v2090_v2 = vsel %vm3978_vm15, %v2082_v33, -inf  ;;  %v2040_v0 = vsel %vm3982_vm3, %v2032_v54, -inf  ;;  %v2690_v9 = vunpack.i.l.bf16 %v2689_v61  ;;  %v2694_v1 = vpop.permute.xlu0 %2693  ;;  %v2684_v10 = vpop.permute.xlu1 %2683 }
 0x8ff   :  { %v2681_v18 = vunpack.i.h.bf16 %v2679_v20  ;;  %v2043_v37 = vmax.f32 %v1993_v21, %v2039_v26  ;;  %v2044_v59 = vmax.f32 %v1994_v55, %v2040_v0  ;;  %v2045_v36 = vmax.f32 %v1995_v52, %v2041_v45 }
 0x900   :  { %v2680_v7 = vunpack.i.l.bf16 %v2679_v20  ;;  %v4322_v42 = vrot.slane %v3901_v40, %v2973_v5  ;;  %vm4098_vm15 = vcmp.eq.s32.totalorder %v4325_v38, 1  ;;  %vm4328_vm3 = vcmask 900096  }
 0x901   :  { %v2134_v14 = vsel %vm4328_vm3, %v2690_v9, %v2691_v30  ;;  %v2696_v13 = vunpack.i.h.bf16 %v2694_v1  ;;  %v2695_v16 = vunpack.i.l.bf16 %v2694_v1  ;;  %v2686_v56 = vunpack.i.h.bf16 %v2684_v10 }
 0x902   :  { %vm4091_vm0 = vcmp.eq.s32.totalorder %v4322_v42, 1  ;;  %v2046_v11 = vmax.f32 %v1996_v24, %v2042_v41  ;;  %vm4329_vm9 = vcmask 908288   ;;  %v2685_v25 = vunpack.i.l.bf16 %v2684_v10  ;;  %v2709_v17 = vpop.permute.xlu0 %2708 }
 0x903   :  { %v2083_v58 = vsel %vm4329_vm9, %v2676_v28, %v2680_v7  ;;  %vm4330_vm10 = vmmov %vm4329_vm9  ;;  %v4331_v23 = vrot.slane %v3924_v35, %v2969_v3  ;;  %v2142_v62 = vsel %vm4013_vm11, %v2134_v14, -inf  ;;  %vm4334_vm2 = vcmask 785408   ;;  %v2699_v3 = vpop.permute.xlu1 %2698 }
 0x904   :  { %v2084_v63 = vsel %vm4330_vm10, %v2680_v7, %v2681_v18  ;;  %v2091_v57 = vsel %vm4017_vm1, %v2083_v58, -inf  ;;  %v2181_v28 = vsel %vm4334_vm2, %v3839_v46, %v2695_v16  ;;  %v4335_v41 = vrot.slane %v3924_v35, %v2973_v5  ;;  %vm4345_vm9 = vmmov %vm4328_vm3 }
 0x905   :  { %vm4108_vm13 = vcmp.eq.s32.totalorder %v4331_v23, 1  ;;  %v2092_v39 = vsel %vm4021_vm8, %v2084_v63, -inf  ;;  %vm4130_vm11 = vcmp.eq.s32.totalorder %v4338_v12, 1  ;;  %v4341_v50 = vrot.slane %v3924_v35, %v2971_v4  ;;  %vm4344_vm8 = vmmov %vm4334_vm2 }
 0x906   :  { %vm4123_vm7 = vcmp.eq.s32.totalorder %v4335_v41, 1  ;;  %v2095_v46 = vmax.f32 %v2045_v36, %v2091_v57  ;;  %v2096_v52 = vmax.f32 %v2046_v11, %v2092_v39  ;;  %v2182_v8 = vsel %vm4344_vm8, %v2695_v16, %v2696_v13  ;;  %vm4351_vm2 = vmmov %vm4328_vm3 }
 0x907   :  { %vm4137_vm1 = vcmp.eq.s32.totalorder %v4341_v50, 1  ;;  %v2189_v33 = vsel %vm4031_vm4, %v2181_v28, -inf  ;;  %v2133_v61 = vsel %vm4328_vm3, %v2686_v56, %v2690_v9  ;;  %v2093_v20 = vmax.f32 %v2043_v37, %v2089_v34  ;;  %v2714_v37 = vpop.permute.xlu0 %2713 }
 0x908   :  { %v2094_v24 = vmax.f32 %v2044_v59, %v2090_v2  ;;  %v2131_v45 = vsel %vm4345_vm9, %v3841_v53, %v2685_v25  ;;  %v4346_v55 = vrot.slane %v3953_v43, %v2973_v5  ;;  %vm4157_vm4 = vcmp.eq.s32.totalorder %v2258_v29, 1  ;;  %v2704_v59 = vpop.permute.xlu1 %2703 }
 0x909   :  { %v2141_v34 = vsel %vm4053_vm14, %v2133_v61, -inf  ;;  %v2132_v54 = vsel %vm4351_vm2, %v2685_v25, %v2686_v56  ;;  %v2139_v53 = vsel %vm4046_vm6, %v2131_v45, -inf  ;;  %v2711_v5 = vunpack.i.h.bf16 %v2709_v17 }
 0x90a   :  { %vm4150_vm10 = vcmp.eq.s32.totalorder %v4346_v55, 1  ;;  %v4352_v26 = vrot.slane %v3924_v35, %v2975_v6  ;;  %vm4176_vm3 = vcmp.eq.s32.totalorder %v2266_v19, 1  ;;  %v2190_v29 = vsel %vm4064_vm12, %v2182_v8, -inf }
 0x90b   :  { %v2140_v27 = vsel %vm4071_vm5, %v2132_v54, -inf  ;;  %v2143_v31 = vmax.f32 %v2093_v20, %v2139_v53  ;;  %v2710_v2 = vunpack.i.l.bf16 %v2709_v17  ;;  %v2145_v0 = vmax.f32 %v2095_v46, %v2141_v34 }
 0x90c   :  { %vm4169_vm8 = vcmp.eq.s32.totalorder %v4352_v26, 1  ;;  %v2144_v35 = vmax.f32 %v2094_v24, %v2140_v27  ;;  %v2701_v9 = vunpack.i.h.bf16 %v2699_v3  ;;  %v2700_v18 = vunpack.i.l.bf16 %v2699_v3  ;;  %v2719_v58 = vpop.permute.xlu1 %2718 }
 0x90d   :  { %vm4357_vm6 = vcmask 777216   ;;  %v2716_v43 = vunpack.i.h.bf16 %v2714_v37  ;;  %v2706_v19 = vunpack.i.h.bf16 %v2704_v59  ;;  %v2146_v36 = vmax.f32 %v2096_v52, %v2142_v62 }
 0x90e   :  { %v2234_v6 = vsel %vm4357_vm6, %v2710_v2, %v2711_v5  ;;  %vm4358_vm14 = vcmask 785408   ;;  %v2715_v1 = vunpack.i.l.bf16 %v2714_v37  ;;  %v2705_v32 = vunpack.i.l.bf16 %v2704_v59  ;;  %vm4360_vm12 = vmmov %vm4357_vm6 }
 0x90f   :  { %v2183_v7 = vsel %vm4358_vm14, %v2696_v13, %v2700_v18  ;;  %vm4359_vm9 = vmmov %vm4358_vm14  ;;  %v2233_v38 = vsel %vm4360_vm12, %v2706_v19, %v2710_v2  ;;  %v2193_v14 = vmax.f32 %v2143_v31, %v2189_v33  ;;  %v2272_v13 = vpop.permute.xlu0 %2271  ;;  %v2194_v63 = vmax.f32 %v2144_v35, %v2190_v29 }
 0x910   :  { %v2184_v48 = vsel %vm4359_vm9, %v2700_v18, %v2701_v9  ;;  %v2191_v10 = vsel %vm4091_vm0, %v2183_v7, -inf  ;;  %vm4361_vm5 = vmmov %vm4357_vm6  ;;  %vm4363_vm6 = vcmask 769024   ;;  %v2721_v23 = vunpack.i.h.bf16 %v2719_v58 }
 0x911   :  { %v2192_v42 = vsel %vm4098_vm15, %v2184_v48, -inf  ;;  %v2195_v16 = vmax.f32 %v2145_v0, %v2191_v10  ;;  %v2231_v56 = vsel %vm4361_vm5, %v3885_v49, %v2705_v32  ;;  %vm4362_vm2 = vmmov %vm4361_vm5  ;;  %v2281_v51 = vsel %vm4363_vm6, %v2272_v13, %v2715_v1 }
 0x912   :  { %v2232_v11 = vsel %vm4362_vm2, %v2705_v32, %v2706_v19  ;;  %v2239_v25 = vsel %vm4108_vm13, %v2231_v56, -inf  ;;  %v2720_v22 = vunpack.i.l.bf16 %v2719_v58  ;;  %v2241_v62 = vsel %vm4123_vm7, %v2233_v38, -inf  ;;  %vm4364_vm0 = vmmov %vm4363_vm6 }
 0x913   :  { %v2243_v57 = vmax.f32 %v2193_v14, %v2239_v25  ;;  %v2289_v39 = vsel %vm4130_vm11, %v2281_v51, -inf  ;;  %v2240_v49 = vsel %vm4137_vm1, %v2232_v11, -inf  ;;  %vm4365_vm15 = vmmov %vm4364_vm0  ;;  %v2196_v52 = vmax.f32 %v2146_v36, %v2192_v42 }
 0x914   :  { %v2283_v28 = vsel %vm4364_vm0, %v2716_v43, %v2720_v22  ;;  %v2284_v41 = vsel %vm4365_vm15, %v2720_v22, %v2721_v23  ;;  %v2244_v40 = vmax.f32 %v2194_v63, %v2240_v49  ;;  %vm4366_vm13 = vmmov %vm4364_vm0  ;;  %v2245_v21 = vmax.f32 %v2195_v16, %v2241_v62 }
 0x915   :  { %v2282_v12 = vsel %vm4366_vm13, %v2715_v1, %v2716_v43  ;;  %v2293_v50 = vmax.f32 %v2243_v57, %v2289_v39  ;;  %v2291_v46 = vsel %vm4150_vm10, %v2283_v28, -inf  ;;  %v2242_v15 = vsel %vm4169_vm8, %v2234_v6, -inf }
 0x916   :  { %v2290_v47 = vsel %vm4157_vm4, %v2282_v12, -inf  ;;  %v2292_v33 = vsel %vm4176_vm3, %v2284_v41, -inf  ;;  %v2246_v17 = vmax.f32 %v2196_v52, %v2242_v15  ;;  %v2295_v3 = vmax.f32 %v2245_v21, %v2291_v46 }
 0x917   :  { %v2294_v8 = vmax.f32 %v2244_v40, %v2290_v47 }
 0x918   :  { %v2296_v61 = vmax.f32 %v2246_v17, %v2292_v33 }
 0x919   :  { %2425 = vmatprep.mubr.f32.mxu0 %v2294_v8 }
 0x91a   :  { %2426 = vmatmul.mubr.f32.vlgmr.msra.gmra.mxu0 %v2293_v50  ;;  %2495 = vmatprep.mubr.f32.mxu1 %v2296_v61 }
 0x91b   :  { %2496 = vmatmul.mubr.f32.vlgmr.msra.gmra.mxu1 %v2295_v3 }
 0x9da   :  { %v2575_v20 = vpop.f32.mrf.mxu0 }
 0x9db   :  { %v2610_v45 = vpop.f32.mrf.mxu1 }
 0x9dc   :  { %v2576_v24 = vpop.f32.mrf.mxu0 }
 0x9dd   :  { %v2611_v55 = vpop.f32.mrf.mxu1  ;;  %v2577_v60 = vadd.f32 %v2576_v24, %v2575_v20 }
 0x9de   :  { %v2612_v44 = vadd.f32 %v2611_v55, %v2610_v45 }
 0x9e0   :  { %v2498_v34 = vadd.f32 %v2612_v44, %v2577_v60 }
 0x9e2   :  { %2501 = vst [vmem:[#allocation15] sm:$0xff] %v2498_v34 }
 0x9e3   :  { %2837 = shalt.err (!%p2834_p1)
}
 0x9e4   :  { %2511 = dma.vmem_to_hbm [thread:$0]  %s2509_s8, 128, %s4230_s12, [#allocation8]  }
 0x9e5   :  { %2852 = dma.done.wait [#allocation8], 128  }
 0x9e6   :  { %2853 = vsyncadd [#allocation8], 4294967168 }
 0x9e7   :  { %2515 = vsyncpa [#allocation7], 1 }
 0x9e8   :  { %2516 = vsyncpa [#allocation10], 1 }
 0x9e9   :  { %2517 = vsyncpa [#allocation13], 1 }
 0x9ea   :  { %2518 = vsyncpa [#allocation8], 1 }

</bundles_post_ra>
